<compile_context>
chip_gen: v7x
topology: tpu7x:2x2x1
jax: 0.10.0
libtpu: 0.0.40
codegen_flags: <defaults>
</compile_context>

<pallas_src>
import functools

import jax
import jax.numpy as jnp
from jax.experimental import pallas as pl
from jax.experimental.pallas import tpu as pltpu


def graph_layer_kernel(
    inputs_ref, memory_ref, graph_ref,
    w_head_ref, b_head_ref,          # [D, D], [1, D]   (1/sqrt(D) pre-folded)
    w_ti_ref, b_ti_ref,              # [D, 2D], [1, 2D] (tail || info)
    w_comb_ref, b_comb_ref,          # [D, D], [1, D]
    w_gx_ref, b_g_ref,               # [D, 3D], [1, 3D] (z|r|h gates, x part)
    w_gh_ref,                        # [D, 2D]          (z|r gates, h part)
    w_hr_ref,                        # [D, D]           (h gate, r*h part)
    gamma_ref, beta_ref,             # [1, D], [1, D]
    out_ref,
    *, num_head):
  f32 = jnp.float32
  tb, S, D = inputs_ref.shape
  M = tb * S
  dh = D // num_head

  x2 = inputs_ref[...].reshape(M, D)      # [M, D]
  mem2 = memory_ref[...].reshape(M, D)    # [M, D]

  # Fused projections (lane-dense MXU outputs).
  head = jnp.dot(x2, w_head_ref[...], preferred_element_type=f32) + b_head_ref[...]
  ti = jnp.dot(mem2, w_ti_ref[...], preferred_element_type=f32) + b_ti_ref[...]
  tail = ti[:, :D]
  info = ti[:, D:]

  head3 = head.reshape(tb, S, D)
  tail3 = tail.reshape(tb, S, D)
  info3 = info.reshape(tb, S, D)

  mask0 = graph_ref[...] == 0.0           # [tb, S, S]  positions with no edge
  w_comb = w_comb_ref[...]                # [D, D]

  # Per-head masked attention; the head concat is fused into the w_comb
  # matmul by accumulating each head's contribution into one [M, D] slab.
  attn = jnp.broadcast_to(b_comb_ref[...], (M, D)).astype(f32)
  for h in range(num_head):
    sl = slice(h * dh, (h + 1) * dh)
    hh = head3[:, :, sl].astype(jnp.bfloat16)   # [tb, S, dh]
    th = tail3[:, :, sl].astype(jnp.bfloat16)
    ih = info3[:, :, sl].astype(jnp.bfloat16)
    # Contract last dims -> no explicit transpose materialized.
    sc = jnp.einsum('bsd,btd->bst', hh, th, preferred_element_type=f32)
    sc = jnp.where(mask0, -1e30, sc)            # finite mask: no NaNs on empty rows
    smax = jnp.max(sc, axis=-1, keepdims=True)
    e = jnp.exp(sc - smax)
    denom = jnp.sum(e, axis=-1, keepdims=True)
    p = e * pl.reciprocal(denom, approx=True)   # divide on the EUP slot
    p = jnp.where(mask0, 0.0, p)                # matches masked_fill(graph, 0.0)
    av = jnp.einsum('bst,btd->bsd', p.astype(jnp.bfloat16), ih,
                    preferred_element_type=f32)  # [tb, S, dh]
    attn = attn + jnp.dot(av.reshape(M, dh), w_comb[sl, :],
                          preferred_element_type=f32)

  # GRU-cell update: x = inputs, h = attn (fused gate matmuls).
  gate_x = jnp.dot(x2, w_gx_ref[...], preferred_element_type=f32) + b_g_ref[...]   # [M, 3D]
  gate_h = jnp.dot(attn, w_gh_ref[...], preferred_element_type=f32)                # [M, 2D]
  z = jax.nn.sigmoid(gate_x[:, :D] + gate_h[:, :D])
  r = jax.nn.sigmoid(gate_x[:, D:2 * D] + gate_h[:, D:])
  h_hat = jnp.tanh(gate_x[:, 2 * D:]
                   + jnp.dot(r * attn, w_hr_ref[...], preferred_element_type=f32))
  new_mem = (1.0 - z) * attn + z * h_hat

  # Dropout is identity at inference.  LayerNorm over last dim (eps = 1e-5).
  mu = jnp.mean(new_mem, axis=-1, keepdims=True)
  var = jnp.mean(jnp.square(new_mem - mu), axis=-1, keepdims=True)
  y = (new_mem - mu) * jax.lax.rsqrt(var + 1e-5)
  y = y * gamma_ref[...] + beta_ref[...]
  out_ref[...] = y.reshape(tb, S, D)


def _pick_block_b(batch, seq):
  """Fold batch into the matmul M dim; aim for ~256 rows per grid step."""
  tb = max(1, min(batch, 256 // max(seq, 1)))
  while batch % tb:
    tb -= 1
  return tb


def _pack_params(p, d_model, scale):
  """Host-side packing: transpose to [D_in, D_out], fuse, fold 1/scale."""
  D = d_model
  inv = 1.0 / scale
  w_head = p["w_head"].T * inv
  b_head = (p["b_head"] * inv)[None, :]
  w_ti = jnp.concatenate([p["w_tail"].T, p["w_info"].T], axis=1)          # [D, 2D]
  b_ti = jnp.concatenate([p["b_tail"], p["b_info"]])[None, :]
  w_comb = p["w_comb"].T
  b_comb = p["b_comb"][None, :]
  # GRU (PyTorch Linear weight layout [out, 2D]):
  #   w_z, w_r act on cat(x, h);  w_h acts on cat(r*h, x).
  w_gx = jnp.concatenate(
      [p["w_z"][:, :D].T, p["w_r"][:, :D].T, p["w_h"][:, D:].T], axis=1)  # [D, 3D]
  b_g = jnp.concatenate([p["b_z"], p["b_r"], p["b_h"]])[None, :]          # [1, 3D]
  w_gh = jnp.concatenate([p["w_z"][:, D:].T, p["w_r"][:, D:].T], axis=1)  # [D, 2D]
  w_hr = p["w_h"][:, :D].T                                                # [D, D]
  gamma = p["gamma"].reshape(1, D)
  beta = p["beta"].reshape(1, D)
  return [w_head, b_head, w_ti, b_ti, w_comb, b_comb,
          w_gx, b_g, w_gh, w_hr, gamma, beta]


def graph_layer(inputs, memory, graph, params, num_head, block_b=None):
  B, S, D = inputs.shape
  scale = float(D) ** 0.5
  packed = _pack_params(params, D, scale)
  tb = block_b if block_b is not None else _pick_block_b(B, S)
  assert B % tb == 0

  kernel = functools.partial(graph_layer_kernel, num_head=num_head)

  def const_spec(shape):
    return pl.BlockSpec(shape, lambda b, _n=len(shape): (0,) * _n)

  in_specs = [
      pl.BlockSpec((tb, S, D), lambda b: (b, 0, 0)),
      pl.BlockSpec((tb, S, D), lambda b: (b, 0, 0)),
      pl.BlockSpec((tb, S, S), lambda b: (b, 0, 0)),
  ] + [const_spec(w.shape) for w in packed]

  # Advisory cost estimate (matmul flops + transcendentals + HBM traffic).
  flops = int(B * S * D * (20 * D + 4 * S))
  transcendentals = int(B * S * (num_head * (S + 1) + 3 * D + 1))
  bytes_accessed = int(4 * (3 * B * S * D + B * S * S
                            + sum(int(w.size) for w in packed)))

  return pl.pallas_call(
      kernel,
      out_shape=jax.ShapeDtypeStruct((B, S, D), jnp.float32),
      grid=(B // tb,),
      in_specs=in_specs,
      out_specs=pl.BlockSpec((tb, S, D), lambda b: (b, 0, 0)),
      compiler_params=pltpu.CompilerParams(
          dimension_semantics=("parallel",),
          vmem_limit_bytes=32 * 1024 * 1024),
      cost_estimate=pl.CostEstimate(
          flops=flops, transcendentals=transcendentals,
          bytes_accessed=bytes_accessed),
  )(inputs, memory, graph, *packed)


def init_params(key, d_model):
  """PyTorch-layout params: Linear weight [out, in], bias [out]."""
  D = d_model
  ks = jax.random.split(key, 7)

  def lin(k, d_in, d_out):
    kw, kb = jax.random.split(k)
    w = jax.random.normal(kw, (d_out, d_in), jnp.float32) * 0.1
    b = jax.random.normal(kb, (d_out,), jnp.float32) * 0.1
    return w, b

  w_head, b_head = lin(ks[0], D, D)
  w_tail, b_tail = lin(ks[1], D, D)
  w_info, b_info = lin(ks[2], D, D)
  w_comb, b_comb = lin(ks[3], D, D)
  w_z, b_z = lin(ks[4], 2 * D, D)
  w_r, b_r = lin(ks[5], 2 * D, D)
  w_h, b_h = lin(ks[6], 2 * D, D)
  return dict(
      w_head=w_head, b_head=b_head, w_tail=w_tail, b_tail=b_tail,
      w_info=w_info, b_info=b_info, w_comb=w_comb, b_comb=b_comb,
      w_z=w_z, b_z=b_z, w_r=w_r, b_r=b_r, w_h=w_h, b_h=b_h,
      gamma=jnp.ones((D,), jnp.float32), beta=jnp.zeros((D,), jnp.float32))


if __name__ == "__main__":
  B, S, D, H = 2, 8, 32, 4

  key = jax.random.PRNGKey(0)
  k_in, k_mem, k_g, k_p = jax.random.split(key, 4)

  inputs = jax.random.normal(k_in, (B, S, D), jnp.float32)
  memory = jax.random.normal(k_mem, (B, S, D), jnp.float32)

  # Binary adjacency graph with self-loops (avoids fully-masked rows).
  graph = (jax.random.uniform(k_g, (B, S, S)) < 0.5).astype(jnp.float32)
  eye = jnp.eye(S, dtype=jnp.float32)[None, :, :]
  graph = jnp.maximum(graph, eye)

  params = init_params(k_p, D)

  out = graph_layer(inputs, memory, graph, params, num_head=H)
  out = jax.block_until_ready(out)
  assert out.shape == (B, S, D)
  assert bool(jnp.all(jnp.isfinite(out)))
  print("KERNEL_OK")
</pallas_src>

<mosaic_0001>
module attributes {stable_mosaic.version = 11 : i64} {
  func.func @graph_layer_kernel(%arg0: i32, %arg1: memref<2x8x32xf32, #tpu.memory_space<vmem>>, %arg2: memref<2x8x32xf32, #tpu.memory_space<vmem>>, %arg3: memref<2x8x8xf32, #tpu.memory_space<vmem>>, %arg4: memref<32x32xf32, #tpu.memory_space<vmem>>, %arg5: memref<1x32xf32, #tpu.memory_space<vmem>>, %arg6: memref<32x64xf32, #tpu.memory_space<vmem>>, %arg7: memref<1x64xf32, #tpu.memory_space<vmem>>, %arg8: memref<32x32xf32, #tpu.memory_space<vmem>>, %arg9: memref<1x32xf32, #tpu.memory_space<vmem>>, %arg10: memref<32x96xf32, #tpu.memory_space<vmem>>, %arg11: memref<1x96xf32, #tpu.memory_space<vmem>>, %arg12: memref<32x64xf32, #tpu.memory_space<vmem>>, %arg13: memref<32x32xf32, #tpu.memory_space<vmem>>, %arg14: memref<1x32xf32, #tpu.memory_space<vmem>>, %arg15: memref<1x32xf32, #tpu.memory_space<vmem>>, %arg16: memref<2x8x32xf32, #tpu.memory_space<vmem>>) attributes {dimension_semantics = [#tpu.dimension_semantics<parallel>], iteration_bounds = array<i64: 1>, scalar_prefetch = 0 : i64, scratch_operands = 0 : i64, tpu.core_type = #tpu.core_type<tc>, window_params = [{transform_indices = @transform_0, window_bounds = array<i64: 2, 8, 32>}, {transform_indices = @transform_1, window_bounds = array<i64: 2, 8, 32>}, {transform_indices = @transform_2, window_bounds = array<i64: 2, 8, 8>}, {pipeline_mode = #tpu.pipeline_mode<synchronous>, transform_indices = @transform_3, window_bounds = array<i64: 32, 32>}, {pipeline_mode = #tpu.pipeline_mode<synchronous>, transform_indices = @transform_4, window_bounds = array<i64: 1, 32>}, {pipeline_mode = #tpu.pipeline_mode<synchronous>, transform_indices = @transform_5, window_bounds = array<i64: 32, 64>}, {pipeline_mode = #tpu.pipeline_mode<synchronous>, transform_indices = @transform_6, window_bounds = array<i64: 1, 64>}, {pipeline_mode = #tpu.pipeline_mode<synchronous>, transform_indices = @transform_7, window_bounds = array<i64: 32, 32>}, {pipeline_mode = #tpu.pipeline_mode<synchronous>, transform_indices = @transform_8, window_bounds = array<i64: 1, 32>}, {pipeline_mode = #tpu.pipeline_mode<synchronous>, transform_indices = @transform_9, window_bounds = array<i64: 32, 96>}, {pipeline_mode = #tpu.pipeline_mode<synchronous>, transform_indices = @transform_10, window_bounds = array<i64: 1, 96>}, {pipeline_mode = #tpu.pipeline_mode<synchronous>, transform_indices = @transform_11, window_bounds = array<i64: 32, 64>}, {pipeline_mode = #tpu.pipeline_mode<synchronous>, transform_indices = @transform_12, window_bounds = array<i64: 32, 32>}, {pipeline_mode = #tpu.pipeline_mode<synchronous>, transform_indices = @transform_13, window_bounds = array<i64: 1, 32>}, {pipeline_mode = #tpu.pipeline_mode<synchronous>, transform_indices = @transform_14, window_bounds = array<i64: 1, 32>}, {transform_indices = @transform_15, window_bounds = array<i64: 2, 8, 32>}]} {
    %c0 = arith.constant 0 : index
    %c0_0 = arith.constant 0 : index
    %c0_1 = arith.constant 0 : index
    %0 = vector.load %arg1[%c0, %c0_0, %c0_1] : memref<2x8x32xf32, #tpu.memory_space<vmem>>, vector<2x8x32xf32>
    %1 = vector.shape_cast %0 : vector<2x8x32xf32> to vector<16x32xf32>
    %c0_2 = arith.constant 0 : index
    %c0_3 = arith.constant 0 : index
    %c0_4 = arith.constant 0 : index
    %2 = vector.load %arg2[%c0_2, %c0_3, %c0_4] : memref<2x8x32xf32, #tpu.memory_space<vmem>>, vector<2x8x32xf32>
    %3 = vector.shape_cast %2 : vector<2x8x32xf32> to vector<16x32xf32>
    %c0_5 = arith.constant 0 : index
    %c0_6 = arith.constant 0 : index
    %4 = vector.load %arg4[%c0_5, %c0_6] : memref<32x32xf32, #tpu.memory_space<vmem>>, vector<32x32xf32>
    %cst = arith.constant dense<0.000000e+00> : vector<16x32xf32>
    %5 = tpu.matmul %1, %4, %cst {dimension_numbers = #tpu.dot_dimension_numbers<[1], [0], [0], [1], [0, 0, 1, 1], [], []>} : vector<16x32xf32>, vector<32x32xf32>, vector<16x32xf32> -> vector<16x32xf32>
    %c0_7 = arith.constant 0 : index
    %c0_8 = arith.constant 0 : index
    %6 = vector.load %arg5[%c0_7, %c0_8] : memref<1x32xf32, #tpu.memory_space<vmem>>, vector<1x32xf32>
    %7 = vector.broadcast %6 : vector<1x32xf32> to vector<16x32xf32>
    %8 = arith.addf %5, %7 : vector<16x32xf32>
    %c0_9 = arith.constant 0 : index
    %c0_10 = arith.constant 0 : index
    %9 = vector.load %arg6[%c0_9, %c0_10] : memref<32x64xf32, #tpu.memory_space<vmem>>, vector<32x64xf32>
    %cst_11 = arith.constant dense<0.000000e+00> : vector<16x64xf32>
    %10 = tpu.matmul %3, %9, %cst_11 {dimension_numbers = #tpu.dot_dimension_numbers<[1], [0], [0], [1], [0, 0, 1, 1], [], []>} : vector<16x32xf32>, vector<32x64xf32>, vector<16x64xf32> -> vector<16x64xf32>
    %c0_12 = arith.constant 0 : index
    %c0_13 = arith.constant 0 : index
    %11 = vector.load %arg7[%c0_12, %c0_13] : memref<1x64xf32, #tpu.memory_space<vmem>>, vector<1x64xf32>
    %12 = vector.broadcast %11 : vector<1x64xf32> to vector<16x64xf32>
    %13 = arith.addf %10, %12 : vector<16x64xf32>
    %14 = vector.extract_strided_slice %13 {offsets = [0, 0], sizes = [16, 32], strides = [1, 1]} : vector<16x64xf32> to vector<16x32xf32>
    %15 = vector.extract_strided_slice %13 {offsets = [0, 32], sizes = [16, 32], strides = [1, 1]} : vector<16x64xf32> to vector<16x32xf32>
    %16 = vector.shape_cast %8 : vector<16x32xf32> to vector<2x8x32xf32>
    %17 = vector.shape_cast %14 : vector<16x32xf32> to vector<2x8x32xf32>
    %18 = vector.shape_cast %15 : vector<16x32xf32> to vector<2x8x32xf32>
    %c0_14 = arith.constant 0 : index
    %c0_15 = arith.constant 0 : index
    %c0_16 = arith.constant 0 : index
    %19 = vector.load %arg3[%c0_14, %c0_15, %c0_16] : memref<2x8x8xf32, #tpu.memory_space<vmem>>, vector<2x8x8xf32>
    %cst_17 = arith.constant 0.000000e+00 : f32
    %20 = vector.broadcast %cst_17 : f32 to vector<2x8x8xf32>
    %21 = arith.cmpf oeq, %19, %20 : vector<2x8x8xf32>
    %c0_18 = arith.constant 0 : index
    %c0_19 = arith.constant 0 : index
    %22 = vector.load %arg8[%c0_18, %c0_19] : memref<32x32xf32, #tpu.memory_space<vmem>>, vector<32x32xf32>
    %c0_20 = arith.constant 0 : index
    %c0_21 = arith.constant 0 : index
    %23 = vector.load %arg9[%c0_20, %c0_21] : memref<1x32xf32, #tpu.memory_space<vmem>>, vector<1x32xf32>
    %24 = vector.shape_cast %23 : vector<1x32xf32> to vector<1x32xf32>
    %25 = vector.broadcast %24 : vector<1x32xf32> to vector<16x32xf32>
    %26 = vector.extract_strided_slice %16 {offsets = [0, 0, 0], sizes = [2, 8, 8], strides = [1, 1, 1]} : vector<2x8x32xf32> to vector<2x8x8xf32>
    %27 = arith.truncf %26 : vector<2x8x8xf32> to vector<2x8x8xbf16>
    %28 = vector.extract_strided_slice %17 {offsets = [0, 0, 0], sizes = [2, 8, 8], strides = [1, 1, 1]} : vector<2x8x32xf32> to vector<2x8x8xf32>
    %29 = arith.truncf %28 : vector<2x8x8xf32> to vector<2x8x8xbf16>
    %30 = vector.extract_strided_slice %18 {offsets = [0, 0, 0], sizes = [2, 8, 8], strides = [1, 1, 1]} : vector<2x8x32xf32> to vector<2x8x8xf32>
    %31 = arith.truncf %30 : vector<2x8x8xf32> to vector<2x8x8xbf16>
    "tpu.trace_start"() <{level = 10 : i32, message = "bsd,btd->bst"}> : () -> ()
    %cst_22 = arith.constant dense<0.000000e+00> : vector<2x8x8xf32>
    %32 = tpu.matmul %27, %29, %cst_22 {dimension_numbers = #tpu.dot_dimension_numbers<[2], [2], [1], [1], [0, 0, 0, 1, 1, 1], [0], [0]>} : vector<2x8x8xbf16>, vector<2x8x8xbf16>, vector<2x8x8xf32> -> vector<2x8x8xf32>
    %cst_23 = arith.constant -1.000000e+30 : f32
    "tpu.trace_stop"() : () -> ()
    %33 = vector.broadcast %cst_23 : f32 to vector<2x8x8xf32>
    %34 = arith.select %21, %33, %32 : vector<2x8x8xi1>, vector<2x8x8xf32>
    %cst_24 = arith.constant dense<0xFF800000> : vector<2x8xf32>
    %35 = vector.multi_reduction <maximumf>, %34, %cst_24 [2] : vector<2x8x8xf32> to vector<2x8xf32>
    %36 = vector.shape_cast %35 : vector<2x8xf32> to vector<2x8x1xf32>
    %37 = vector.broadcast %36 : vector<2x8x1xf32> to vector<2x8x8xf32>
    %38 = arith.subf %34, %37 : vector<2x8x8xf32>
    %39 = math.exp %38 : vector<2x8x8xf32>
    %cst_25 = arith.constant dense<0.000000e+00> : vector<2x8xf32>
    %40 = vector.multi_reduction <add>, %39, %cst_25 [2] : vector<2x8x8xf32> to vector<2x8xf32>
    %41 = vector.shape_cast %40 : vector<2x8xf32> to vector<2x8x1xf32>
    %42 = tpu.reciprocal %41 {approx = true} : vector<2x8x1xf32> -> vector<2x8x1xf32>
    %43 = vector.broadcast %42 : vector<2x8x1xf32> to vector<2x8x8xf32>
    %44 = arith.mulf %39, %43 : vector<2x8x8xf32>
    %cst_26 = arith.constant 0.000000e+00 : f32
    %45 = vector.broadcast %cst_26 : f32 to vector<2x8x8xf32>
    %46 = arith.select %21, %45, %44 : vector<2x8x8xi1>, vector<2x8x8xf32>
    %47 = arith.truncf %46 : vector<2x8x8xf32> to vector<2x8x8xbf16>
    "tpu.trace_start"() <{level = 10 : i32, message = "bst,btd->bsd"}> : () -> ()
    %cst_27 = arith.constant dense<0.000000e+00> : vector<2x8x8xf32>
    %48 = tpu.matmul %47, %31, %cst_27 {dimension_numbers = #tpu.dot_dimension_numbers<[2], [1], [1], [2], [0, 0, 0, 1, 1, 2], [0], [0]>} : vector<2x8x8xbf16>, vector<2x8x8xbf16>, vector<2x8x8xf32> -> vector<2x8x8xf32>
    "tpu.trace_stop"() : () -> ()
    %49 = vector.shape_cast %48 : vector<2x8x8xf32> to vector<16x8xf32>
    %50 = vector.extract_strided_slice %22 {offsets = [0, 0], sizes = [8, 32], strides = [1, 1]} : vector<32x32xf32> to vector<8x32xf32>
    %cst_28 = arith.constant dense<0.000000e+00> : vector<16x32xf32>
    %51 = tpu.matmul %49, %50, %cst_28 {dimension_numbers = #tpu.dot_dimension_numbers<[1], [0], [0], [1], [0, 0, 1, 1], [], []>} : vector<16x8xf32>, vector<8x32xf32>, vector<16x32xf32> -> vector<16x32xf32>
    %52 = arith.addf %25, %51 : vector<16x32xf32>
    %53 = vector.extract_strided_slice %16 {offsets = [0, 0, 8], sizes = [2, 8, 8], strides = [1, 1, 1]} : vector<2x8x32xf32> to vector<2x8x8xf32>
    %54 = arith.truncf %53 : vector<2x8x8xf32> to vector<2x8x8xbf16>
    %55 = vector.extract_strided_slice %17 {offsets = [0, 0, 8], sizes = [2, 8, 8], strides = [1, 1, 1]} : vector<2x8x32xf32> to vector<2x8x8xf32>
    %56 = arith.truncf %55 : vector<2x8x8xf32> to vector<2x8x8xbf16>
    %57 = vector.extract_strided_slice %18 {offsets = [0, 0, 8], sizes = [2, 8, 8], strides = [1, 1, 1]} : vector<2x8x32xf32> to vector<2x8x8xf32>
    %58 = arith.truncf %57 : vector<2x8x8xf32> to vector<2x8x8xbf16>
    "tpu.trace_start"() <{level = 10 : i32, message = "bsd,btd->bst"}> : () -> ()
    %cst_29 = arith.constant dense<0.000000e+00> : vector<2x8x8xf32>
    %59 = tpu.matmul %54, %56, %cst_29 {dimension_numbers = #tpu.dot_dimension_numbers<[2], [2], [1], [1], [0, 0, 0, 1, 1, 1], [0], [0]>} : vector<2x8x8xbf16>, vector<2x8x8xbf16>, vector<2x8x8xf32> -> vector<2x8x8xf32>
    %cst_30 = arith.constant -1.000000e+30 : f32
    "tpu.trace_stop"() : () -> ()
    %60 = vector.broadcast %cst_30 : f32 to vector<2x8x8xf32>
    %61 = arith.select %21, %60, %59 : vector<2x8x8xi1>, vector<2x8x8xf32>
    %cst_31 = arith.constant dense<0xFF800000> : vector<2x8xf32>
    %62 = vector.multi_reduction <maximumf>, %61, %cst_31 [2] : vector<2x8x8xf32> to vector<2x8xf32>
    %63 = vector.shape_cast %62 : vector<2x8xf32> to vector<2x8x1xf32>
    %64 = vector.broadcast %63 : vector<2x8x1xf32> to vector<2x8x8xf32>
    %65 = arith.subf %61, %64 : vector<2x8x8xf32>
    %66 = math.exp %65 : vector<2x8x8xf32>
    %cst_32 = arith.constant dense<0.000000e+00> : vector<2x8xf32>
    %67 = vector.multi_reduction <add>, %66, %cst_32 [2] : vector<2x8x8xf32> to vector<2x8xf32>
    %68 = vector.shape_cast %67 : vector<2x8xf32> to vector<2x8x1xf32>
    %69 = tpu.reciprocal %68 {approx = true} : vector<2x8x1xf32> -> vector<2x8x1xf32>
    %70 = vector.broadcast %69 : vector<2x8x1xf32> to vector<2x8x8xf32>
    %71 = arith.mulf %66, %70 : vector<2x8x8xf32>
    %cst_33 = arith.constant 0.000000e+00 : f32
    %72 = vector.broadcast %cst_33 : f32 to vector<2x8x8xf32>
    %73 = arith.select %21, %72, %71 : vector<2x8x8xi1>, vector<2x8x8xf32>
    %74 = arith.truncf %73 : vector<2x8x8xf32> to vector<2x8x8xbf16>
    "tpu.trace_start"() <{level = 10 : i32, message = "bst,btd->bsd"}> : () -> ()
    %cst_34 = arith.constant dense<0.000000e+00> : vector<2x8x8xf32>
    %75 = tpu.matmul %74, %58, %cst_34 {dimension_numbers = #tpu.dot_dimension_numbers<[2], [1], [1], [2], [0, 0, 0, 1, 1, 2], [0], [0]>} : vector<2x8x8xbf16>, vector<2x8x8xbf16>, vector<2x8x8xf32> -> vector<2x8x8xf32>
    "tpu.trace_stop"() : () -> ()
    %76 = vector.shape_cast %75 : vector<2x8x8xf32> to vector<16x8xf32>
    %77 = vector.extract_strided_slice %22 {offsets = [8, 0], sizes = [8, 32], strides = [1, 1]} : vector<32x32xf32> to vector<8x32xf32>
    %cst_35 = arith.constant dense<0.000000e+00> : vector<16x32xf32>
    %78 = tpu.matmul %76, %77, %cst_35 {dimension_numbers = #tpu.dot_dimension_numbers<[1], [0], [0], [1], [0, 0, 1, 1], [], []>} : vector<16x8xf32>, vector<8x32xf32>, vector<16x32xf32> -> vector<16x32xf32>
    %79 = arith.addf %52, %78 : vector<16x32xf32>
    %80 = vector.extract_strided_slice %16 {offsets = [0, 0, 16], sizes = [2, 8, 8], strides = [1, 1, 1]} : vector<2x8x32xf32> to vector<2x8x8xf32>
    %81 = arith.truncf %80 : vector<2x8x8xf32> to vector<2x8x8xbf16>
    %82 = vector.extract_strided_slice %17 {offsets = [0, 0, 16], sizes = [2, 8, 8], strides = [1, 1, 1]} : vector<2x8x32xf32> to vector<2x8x8xf32>
    %83 = arith.truncf %82 : vector<2x8x8xf32> to vector<2x8x8xbf16>
    %84 = vector.extract_strided_slice %18 {offsets = [0, 0, 16], sizes = [2, 8, 8], strides = [1, 1, 1]} : vector<2x8x32xf32> to vector<2x8x8xf32>
    %85 = arith.truncf %84 : vector<2x8x8xf32> to vector<2x8x8xbf16>
    "tpu.trace_start"() <{level = 10 : i32, message = "bsd,btd->bst"}> : () -> ()
    %cst_36 = arith.constant dense<0.000000e+00> : vector<2x8x8xf32>
    %86 = tpu.matmul %81, %83, %cst_36 {dimension_numbers = #tpu.dot_dimension_numbers<[2], [2], [1], [1], [0, 0, 0, 1, 1, 1], [0], [0]>} : vector<2x8x8xbf16>, vector<2x8x8xbf16>, vector<2x8x8xf32> -> vector<2x8x8xf32>
    %cst_37 = arith.constant -1.000000e+30 : f32
    "tpu.trace_stop"() : () -> ()
    %87 = vector.broadcast %cst_37 : f32 to vector<2x8x8xf32>
    %88 = arith.select %21, %87, %86 : vector<2x8x8xi1>, vector<2x8x8xf32>
    %cst_38 = arith.constant dense<0xFF800000> : vector<2x8xf32>
    %89 = vector.multi_reduction <maximumf>, %88, %cst_38 [2] : vector<2x8x8xf32> to vector<2x8xf32>
    %90 = vector.shape_cast %89 : vector<2x8xf32> to vector<2x8x1xf32>
    %91 = vector.broadcast %90 : vector<2x8x1xf32> to vector<2x8x8xf32>
    %92 = arith.subf %88, %91 : vector<2x8x8xf32>
    %93 = math.exp %92 : vector<2x8x8xf32>
    %cst_39 = arith.constant dense<0.000000e+00> : vector<2x8xf32>
    %94 = vector.multi_reduction <add>, %93, %cst_39 [2] : vector<2x8x8xf32> to vector<2x8xf32>
    %95 = vector.shape_cast %94 : vector<2x8xf32> to vector<2x8x1xf32>
    %96 = tpu.reciprocal %95 {approx = true} : vector<2x8x1xf32> -> vector<2x8x1xf32>
    %97 = vector.broadcast %96 : vector<2x8x1xf32> to vector<2x8x8xf32>
    %98 = arith.mulf %93, %97 : vector<2x8x8xf32>
    %cst_40 = arith.constant 0.000000e+00 : f32
    %99 = vector.broadcast %cst_40 : f32 to vector<2x8x8xf32>
    %100 = arith.select %21, %99, %98 : vector<2x8x8xi1>, vector<2x8x8xf32>
    %101 = arith.truncf %100 : vector<2x8x8xf32> to vector<2x8x8xbf16>
    "tpu.trace_start"() <{level = 10 : i32, message = "bst,btd->bsd"}> : () -> ()
    %cst_41 = arith.constant dense<0.000000e+00> : vector<2x8x8xf32>
    %102 = tpu.matmul %101, %85, %cst_41 {dimension_numbers = #tpu.dot_dimension_numbers<[2], [1], [1], [2], [0, 0, 0, 1, 1, 2], [0], [0]>} : vector<2x8x8xbf16>, vector<2x8x8xbf16>, vector<2x8x8xf32> -> vector<2x8x8xf32>
    "tpu.trace_stop"() : () -> ()
    %103 = vector.shape_cast %102 : vector<2x8x8xf32> to vector<16x8xf32>
    %104 = vector.extract_strided_slice %22 {offsets = [16, 0], sizes = [8, 32], strides = [1, 1]} : vector<32x32xf32> to vector<8x32xf32>
    %cst_42 = arith.constant dense<0.000000e+00> : vector<16x32xf32>
    %105 = tpu.matmul %103, %104, %cst_42 {dimension_numbers = #tpu.dot_dimension_numbers<[1], [0], [0], [1], [0, 0, 1, 1], [], []>} : vector<16x8xf32>, vector<8x32xf32>, vector<16x32xf32> -> vector<16x32xf32>
    %106 = arith.addf %79, %105 : vector<16x32xf32>
    %107 = vector.extract_strided_slice %16 {offsets = [0, 0, 24], sizes = [2, 8, 8], strides = [1, 1, 1]} : vector<2x8x32xf32> to vector<2x8x8xf32>
    %108 = arith.truncf %107 : vector<2x8x8xf32> to vector<2x8x8xbf16>
    %109 = vector.extract_strided_slice %17 {offsets = [0, 0, 24], sizes = [2, 8, 8], strides = [1, 1, 1]} : vector<2x8x32xf32> to vector<2x8x8xf32>
    %110 = arith.truncf %109 : vector<2x8x8xf32> to vector<2x8x8xbf16>
    %111 = vector.extract_strided_slice %18 {offsets = [0, 0, 24], sizes = [2, 8, 8], strides = [1, 1, 1]} : vector<2x8x32xf32> to vector<2x8x8xf32>
    %112 = arith.truncf %111 : vector<2x8x8xf32> to vector<2x8x8xbf16>
    "tpu.trace_start"() <{level = 10 : i32, message = "bsd,btd->bst"}> : () -> ()
    %cst_43 = arith.constant dense<0.000000e+00> : vector<2x8x8xf32>
    %113 = tpu.matmul %108, %110, %cst_43 {dimension_numbers = #tpu.dot_dimension_numbers<[2], [2], [1], [1], [0, 0, 0, 1, 1, 1], [0], [0]>} : vector<2x8x8xbf16>, vector<2x8x8xbf16>, vector<2x8x8xf32> -> vector<2x8x8xf32>
    %cst_44 = arith.constant -1.000000e+30 : f32
    "tpu.trace_stop"() : () -> ()
    %114 = vector.broadcast %cst_44 : f32 to vector<2x8x8xf32>
    %115 = arith.select %21, %114, %113 : vector<2x8x8xi1>, vector<2x8x8xf32>
    %cst_45 = arith.constant dense<0xFF800000> : vector<2x8xf32>
    %116 = vector.multi_reduction <maximumf>, %115, %cst_45 [2] : vector<2x8x8xf32> to vector<2x8xf32>
    %117 = vector.shape_cast %116 : vector<2x8xf32> to vector<2x8x1xf32>
    %118 = vector.broadcast %117 : vector<2x8x1xf32> to vector<2x8x8xf32>
    %119 = arith.subf %115, %118 : vector<2x8x8xf32>
    %120 = math.exp %119 : vector<2x8x8xf32>
    %cst_46 = arith.constant dense<0.000000e+00> : vector<2x8xf32>
    %121 = vector.multi_reduction <add>, %120, %cst_46 [2] : vector<2x8x8xf32> to vector<2x8xf32>
    %122 = vector.shape_cast %121 : vector<2x8xf32> to vector<2x8x1xf32>
    %123 = tpu.reciprocal %122 {approx = true} : vector<2x8x1xf32> -> vector<2x8x1xf32>
    %124 = vector.broadcast %123 : vector<2x8x1xf32> to vector<2x8x8xf32>
    %125 = arith.mulf %120, %124 : vector<2x8x8xf32>
    %cst_47 = arith.constant 0.000000e+00 : f32
    %126 = vector.broadcast %cst_47 : f32 to vector<2x8x8xf32>
    %127 = arith.select %21, %126, %125 : vector<2x8x8xi1>, vector<2x8x8xf32>
    %128 = arith.truncf %127 : vector<2x8x8xf32> to vector<2x8x8xbf16>
    "tpu.trace_start"() <{level = 10 : i32, message = "bst,btd->bsd"}> : () -> ()
    %cst_48 = arith.constant dense<0.000000e+00> : vector<2x8x8xf32>
    %129 = tpu.matmul %128, %112, %cst_48 {dimension_numbers = #tpu.dot_dimension_numbers<[2], [1], [1], [2], [0, 0, 0, 1, 1, 2], [0], [0]>} : vector<2x8x8xbf16>, vector<2x8x8xbf16>, vector<2x8x8xf32> -> vector<2x8x8xf32>
    "tpu.trace_stop"() : () -> ()
    %130 = vector.shape_cast %129 : vector<2x8x8xf32> to vector<16x8xf32>
    %131 = vector.extract_strided_slice %22 {offsets = [24, 0], sizes = [8, 32], strides = [1, 1]} : vector<32x32xf32> to vector<8x32xf32>
    %cst_49 = arith.constant dense<0.000000e+00> : vector<16x32xf32>
    %132 = tpu.matmul %130, %131, %cst_49 {dimension_numbers = #tpu.dot_dimension_numbers<[1], [0], [0], [1], [0, 0, 1, 1], [], []>} : vector<16x8xf32>, vector<8x32xf32>, vector<16x32xf32> -> vector<16x32xf32>
    %133 = arith.addf %106, %132 : vector<16x32xf32>
    %c0_50 = arith.constant 0 : index
    %c0_51 = arith.constant 0 : index
    %134 = vector.load %arg10[%c0_50, %c0_51] : memref<32x96xf32, #tpu.memory_space<vmem>>, vector<32x96xf32>
    %cst_52 = arith.constant dense<0.000000e+00> : vector<16x96xf32>
    %135 = tpu.matmul %1, %134, %cst_52 {dimension_numbers = #tpu.dot_dimension_numbers<[1], [0], [0], [1], [0, 0, 1, 1], [], []>} : vector<16x32xf32>, vector<32x96xf32>, vector<16x96xf32> -> vector<16x96xf32>
    %c0_53 = arith.constant 0 : index
    %c0_54 = arith.constant 0 : index
    %136 = vector.load %arg11[%c0_53, %c0_54] : memref<1x96xf32, #tpu.memory_space<vmem>>, vector<1x96xf32>
    %137 = vector.broadcast %136 : vector<1x96xf32> to vector<16x96xf32>
    %138 = arith.addf %135, %137 : vector<16x96xf32>
    %c0_55 = arith.constant 0 : index
    %c0_56 = arith.constant 0 : index
    %139 = vector.load %arg12[%c0_55, %c0_56] : memref<32x64xf32, #tpu.memory_space<vmem>>, vector<32x64xf32>
    %cst_57 = arith.constant dense<0.000000e+00> : vector<16x64xf32>
    %140 = tpu.matmul %133, %139, %cst_57 {dimension_numbers = #tpu.dot_dimension_numbers<[1], [0], [0], [1], [0, 0, 1, 1], [], []>} : vector<16x32xf32>, vector<32x64xf32>, vector<16x64xf32> -> vector<16x64xf32>
    %141 = vector.extract_strided_slice %138 {offsets = [0, 0], sizes = [16, 32], strides = [1, 1]} : vector<16x96xf32> to vector<16x32xf32>
    %142 = vector.extract_strided_slice %140 {offsets = [0, 0], sizes = [16, 32], strides = [1, 1]} : vector<16x64xf32> to vector<16x32xf32>
    %143 = arith.addf %141, %142 : vector<16x32xf32>
    %144 = arith.negf %143 : vector<16x32xf32>
    %145 = math.exp %144 : vector<16x32xf32>
    %cst_58 = arith.constant 1.000000e+00 : f32
    %146 = vector.broadcast %cst_58 : f32 to vector<16x32xf32>
    %147 = arith.addf %146, %145 : vector<16x32xf32>
    %148 = arith.divf %146, %147 : vector<16x32xf32>
    %149 = vector.extract_strided_slice %138 {offsets = [0, 32], sizes = [16, 32], strides = [1, 1]} : vector<16x96xf32> to vector<16x32xf32>
    %150 = vector.extract_strided_slice %140 {offsets = [0, 32], sizes = [16, 32], strides = [1, 1]} : vector<16x64xf32> to vector<16x32xf32>
    %151 = arith.addf %149, %150 : vector<16x32xf32>
    %152 = arith.negf %151 : vector<16x32xf32>
    %153 = math.exp %152 : vector<16x32xf32>
    %cst_59 = arith.constant 1.000000e+00 : f32
    %154 = vector.broadcast %cst_59 : f32 to vector<16x32xf32>
    %155 = arith.addf %154, %153 : vector<16x32xf32>
    %156 = arith.divf %154, %155 : vector<16x32xf32>
    %157 = vector.extract_strided_slice %138 {offsets = [0, 64], sizes = [16, 32], strides = [1, 1]} : vector<16x96xf32> to vector<16x32xf32>
    %158 = arith.mulf %156, %133 : vector<16x32xf32>
    %c0_60 = arith.constant 0 : index
    %c0_61 = arith.constant 0 : index
    %159 = vector.load %arg13[%c0_60, %c0_61] : memref<32x32xf32, #tpu.memory_space<vmem>>, vector<32x32xf32>
    %cst_62 = arith.constant dense<0.000000e+00> : vector<16x32xf32>
    %160 = tpu.matmul %158, %159, %cst_62 {dimension_numbers = #tpu.dot_dimension_numbers<[1], [0], [0], [1], [0, 0, 1, 1], [], []>} : vector<16x32xf32>, vector<32x32xf32>, vector<16x32xf32> -> vector<16x32xf32>
    %161 = arith.addf %157, %160 : vector<16x32xf32>
    %162 = math.tanh %161 : vector<16x32xf32>
    %cst_63 = arith.constant 1.000000e+00 : f32
    %163 = vector.broadcast %cst_63 : f32 to vector<16x32xf32>
    %164 = arith.subf %163, %148 : vector<16x32xf32>
    %165 = arith.mulf %164, %133 : vector<16x32xf32>
    %166 = arith.mulf %148, %162 : vector<16x32xf32>
    %167 = arith.addf %165, %166 : vector<16x32xf32>
    %cst_64 = arith.constant dense<0.000000e+00> : vector<16xf32>
    %168 = vector.multi_reduction <add>, %167, %cst_64 [1] : vector<16x32xf32> to vector<16xf32>
    %169 = vector.shape_cast %168 : vector<16xf32> to vector<16x1xf32>
    %cst_65 = arith.constant 3.200000e+01 : f32
    %170 = vector.broadcast %cst_65 : f32 to vector<16x1xf32>
    %171 = arith.divf %169, %170 : vector<16x1xf32>
    %172 = vector.broadcast %171 : vector<16x1xf32> to vector<16x32xf32>
    %173 = arith.subf %167, %172 : vector<16x32xf32>
    %174 = arith.mulf %173, %173 : vector<16x32xf32>
    %cst_66 = arith.constant dense<0.000000e+00> : vector<16xf32>
    %175 = vector.multi_reduction <add>, %174, %cst_66 [1] : vector<16x32xf32> to vector<16xf32>
    %176 = vector.shape_cast %175 : vector<16xf32> to vector<16x1xf32>
    %cst_67 = arith.constant 3.200000e+01 : f32
    %177 = vector.broadcast %cst_67 : f32 to vector<16x1xf32>
    %178 = arith.divf %176, %177 : vector<16x1xf32>
    %179 = vector.broadcast %171 : vector<16x1xf32> to vector<16x32xf32>
    %180 = arith.subf %167, %179 : vector<16x32xf32>
    %cst_68 = arith.constant 9.99999974E-6 : f32
    %181 = vector.broadcast %cst_68 : f32 to vector<16x1xf32>
    %182 = arith.addf %178, %181 : vector<16x1xf32>
    %183 = math.rsqrt %182 : vector<16x1xf32>
    %184 = vector.broadcast %183 : vector<16x1xf32> to vector<16x32xf32>
    %185 = arith.mulf %180, %184 : vector<16x32xf32>
    %c0_69 = arith.constant 0 : index
    %c0_70 = arith.constant 0 : index
    %186 = vector.load %arg14[%c0_69, %c0_70] : memref<1x32xf32, #tpu.memory_space<vmem>>, vector<1x32xf32>
    %187 = vector.broadcast %186 : vector<1x32xf32> to vector<16x32xf32>
    %188 = arith.mulf %185, %187 : vector<16x32xf32>
    %c0_71 = arith.constant 0 : index
    %c0_72 = arith.constant 0 : index
    %189 = vector.load %arg15[%c0_71, %c0_72] : memref<1x32xf32, #tpu.memory_space<vmem>>, vector<1x32xf32>
    %190 = vector.broadcast %189 : vector<1x32xf32> to vector<16x32xf32>
    %191 = arith.addf %188, %190 : vector<16x32xf32>
    %192 = vector.shape_cast %191 : vector<16x32xf32> to vector<2x8x32xf32>
    %c0_73 = arith.constant 0 : index
    %c0_74 = arith.constant 0 : index
    %c0_75 = arith.constant 0 : index
    %193 = vector.load %arg16[%c0_73, %c0_74, %c0_75] : memref<2x8x32xf32, #tpu.memory_space<vmem>>, vector<2x8x32xf32>
    tpu.vector_store %arg16[%c0_73, %c0_74, %c0_75], %192 {strides = array<i32>} : memref<2x8x32xf32, #tpu.memory_space<vmem>>, vector<2x8x32xf32>,
    return
  }
  func.func @transform_0(%arg0: i32) -> (i32, i32, i32) {
    %c0_i32 = arith.constant 0 : i32
    %c0_i32_0 = arith.constant 0 : i32
    %c0_i32_1 = arith.constant 0 : i32
    return %arg0, %c0_i32, %c0_i32_0 : i32, i32, i32
  }
  func.func @transform_1(%arg0: i32) -> (i32, i32, i32) {
    %c0_i32 = arith.constant 0 : i32
    %c0_i32_0 = arith.constant 0 : i32
    %c0_i32_1 = arith.constant 0 : i32
    return %arg0, %c0_i32, %c0_i32_0 : i32, i32, i32
  }
  func.func @transform_2(%arg0: i32) -> (i32, i32, i32) {
    %c0_i32 = arith.constant 0 : i32
    %c0_i32_0 = arith.constant 0 : i32
    %c0_i32_1 = arith.constant 0 : i32
    return %arg0, %c0_i32, %c0_i32_0 : i32, i32, i32
  }
  func.func @transform_3(%arg0: i32) -> (i32, i32) {
    %c0_i32 = arith.constant 0 : i32
    %c0_i32_0 = arith.constant 0 : i32
    %c0_i32_1 = arith.constant 0 : i32
    return %c0_i32, %c0_i32_0 : i32, i32
  }
  func.func @transform_4(%arg0: i32) -> (i32, i32) {
    %c0_i32 = arith.constant 0 : i32
    %c0_i32_0 = arith.constant 0 : i32
    %c0_i32_1 = arith.constant 0 : i32
    return %c0_i32, %c0_i32_0 : i32, i32
  }
  func.func @transform_5(%arg0: i32) -> (i32, i32) {
    %c0_i32 = arith.constant 0 : i32
    %c0_i32_0 = arith.constant 0 : i32
    %c0_i32_1 = arith.constant 0 : i32
    return %c0_i32, %c0_i32_0 : i32, i32
  }
  func.func @transform_6(%arg0: i32) -> (i32, i32) {
    %c0_i32 = arith.constant 0 : i32
    %c0_i32_0 = arith.constant 0 : i32
    %c0_i32_1 = arith.constant 0 : i32
    return %c0_i32, %c0_i32_0 : i32, i32
  }
  func.func @transform_7(%arg0: i32) -> (i32, i32) {
    %c0_i32 = arith.constant 0 : i32
    %c0_i32_0 = arith.constant 0 : i32
    %c0_i32_1 = arith.constant 0 : i32
    return %c0_i32, %c0_i32_0 : i32, i32
  }
  func.func @transform_8(%arg0: i32) -> (i32, i32) {
    %c0_i32 = arith.constant 0 : i32
    %c0_i32_0 = arith.constant 0 : i32
    %c0_i32_1 = arith.constant 0 : i32
    return %c0_i32, %c0_i32_0 : i32, i32
  }
  func.func @transform_9(%arg0: i32) -> (i32, i32) {
    %c0_i32 = arith.constant 0 : i32
    %c0_i32_0 = arith.constant 0 : i32
    %c0_i32_1 = arith.constant 0 : i32
    return %c0_i32, %c0_i32_0 : i32, i32
  }
  func.func @transform_10(%arg0: i32) -> (i32, i32) {
    %c0_i32 = arith.constant 0 : i32
    %c0_i32_0 = arith.constant 0 : i32
    %c0_i32_1 = arith.constant 0 : i32
    return %c0_i32, %c0_i32_0 : i32, i32
  }
  func.func @transform_11(%arg0: i32) -> (i32, i32) {
    %c0_i32 = arith.constant 0 : i32
    %c0_i32_0 = arith.constant 0 : i32
    %c0_i32_1 = arith.constant 0 : i32
    return %c0_i32, %c0_i32_0 : i32, i32
  }
  func.func @transform_12(%arg0: i32) -> (i32, i32) {
    %c0_i32 = arith.constant 0 : i32
    %c0_i32_0 = arith.constant 0 : i32
    %c0_i32_1 = arith.constant 0 : i32
    return %c0_i32, %c0_i32_0 : i32, i32
  }
  func.func @transform_13(%arg0: i32) -> (i32, i32) {
    %c0_i32 = arith.constant 0 : i32
    %c0_i32_0 = arith.constant 0 : i32
    %c0_i32_1 = arith.constant 0 : i32
    return %c0_i32, %c0_i32_0 : i32, i32
  }
  func.func @transform_14(%arg0: i32) -> (i32, i32) {
    %c0_i32 = arith.constant 0 : i32
    %c0_i32_0 = arith.constant 0 : i32
    %c0_i32_1 = arith.constant 0 : i32
    return %c0_i32, %c0_i32_0 : i32, i32
  }
  func.func @transform_15(%arg0: i32) -> (i32, i32, i32) {
    %c0_i32 = arith.constant 0 : i32
    %c0_i32_0 = arith.constant 0 : i32
    %c0_i32_1 = arith.constant 0 : i32
    return %arg0, %c0_i32, %c0_i32_0 : i32, i32, i32
  }
}

</mosaic_0001>

<bundles_post_ra>
// kernel: tpu_custom_call.1
= control target key start
LH: loop header
LB: loop body
LE: loop exit
PB: predicated region body
PF: predicated region fallthrough
CT: control target
= control target key end

     0   :  { %20 = vsyncpa [#allocation3], 0  ;;  %s3140_s0 = inlined_call_operand.hbm [shape: f32[2,8,32], index: 0, kind: input, shape index: {}]   ;;  %s3141_s1 = inlined_call_operand.hbm [shape: f32[2,8,32], index: 1, kind: input, shape index: {}]   ;;  %s3142_s2 = inlined_call_operand.hbm [shape: f32[2,8,8], index: 2, kind: input, shape index: {}]   ;;  %s3143_s3 = inlined_call_operand.hbm [shape: f32[32,32], index: 3, kind: input, shape index: {}]   ;;  %s3144_s4 = inlined_call_operand.vmem [shape: f32[1,32], index: 4, kind: input, shape index: {}]   ;;  %s3145_s5 = inlined_call_operand.hbm [shape: f32[32,64], index: 5, kind: input, shape index: {}]   ;;  %s3146_s6 = inlined_call_operand.vmem [shape: f32[1,64], index: 6, kind: input, shape index: {}]   ;;  %s3147_s7 = inlined_call_operand.hbm [shape: f32[32,32], index: 7, kind: input, shape index: {}]   ;;  %s3148_s8 = inlined_call_operand.hbm [shape: f32[1,32], index: 8, kind: input, shape index: {}]   ;;  %s3149_s9 = inlined_call_operand.vmem [shape: f32[32,96], index: 9, kind: input, shape index: {}]   ;;  %s3150_s10 = inlined_call_operand.vmem [shape: f32[1,96], index: 10, kind: input, shape index: {}]   ;;  %s3151_s11 = inlined_call_operand.hbm [shape: f32[32,64], index: 11, kind: input, shape index: {}]   ;;  %s3152_s12 = inlined_call_operand.hbm [shape: f32[32,32], index: 12, kind: input, shape index: {}]   ;;  %s3153_s13 = inlined_call_operand.vmem [shape: f32[1,32], index: 13, kind: input, shape index: {}]   ;;  %s3154_s14 = inlined_call_operand.vmem [shape: f32[1,32], index: 14, kind: input, shape index: {}]   ;;  %s3155_s15 = inlined_call_operand.hbm [shape: f32[2,8,32], index: 15, kind: output, shape index: {}]  }
   0x1   :  { %21 = vsyncpa [#allocation6], 0 }
   0x2   :  { %22 = vsyncpa [#allocation9], 0 }
   0x3   :  { %23 = vsyncpa [#allocation12], 0 }
   0x4   :  { %24 = vsyncpa [#allocation15], 0 }
   0x5   :  { %25 = vsyncpa [#allocation4], 0  ;;  %s2622_s18 = smov [#allocation5]   ;;  %s2623_s20 = smov [#allocation8]  }
   0x6   :  { %s43_s19 = sshll.u32 %s2622_s18, 4  ;;  %s67_s21 = sshll.u32 %s2623_s20, 4  ;;  %s44_s19 = int_to_ptr.vmem [resolvable:$true] %s43_s19  ;;  %s2725_s21 = int_to_ptr.vmem [resolvable:$true] %s67_s21 }
   0x7   :  { %s2390_s24 = scalar_lea.hbm %s3141_s1, 256 }
   0x8   :  { %p2391_p0 = scmp.ne.s32.totalorder %s3141_s1, %s2390_s24  ;;  %p2394_p1 = scmp.lt.u32.totalorder %s2390_s24, %s3141_s1 }
   0xa   :  { %p2396_p2 = pnand %p2394_p1, %p2391_p0 }
   0xc   :  { %2399 = shalt.err (!%p2396_p2)
}
   0xd   :  { %s2400_s29 = scalar_lea.vmem %s44_s19, 256  ;;  %p2405_p4 = scmp.lt.s32.totalorder %s44_s19, %s44_s19 }
   0xe   :  { %p2401_p3 = scmp.ne.s32.totalorder %s44_s19, %s2400_s29  ;;  %p2406_p5 = scmp.lt.s32.totalorder %s2400_s29, %s2400_s29 }
  0x10   :  { %p2407_p6 = por %p2406_p5, %p2405_p4 }
  0x12   :  { %p2408_p7 = pnand %p2407_p6, %p2401_p3 }
  0x14   :  { %2411 = shalt.err (!%p2408_p7)
}
  0x15   :  { %s2624_s30 = smov 128   ;;  %s2625_s16 = smov 8  }
  0x16   :  { %49 = dma.hbm_to_vmem [thread:$0]  %s3141_s1, 256, %s44_s19, [#allocation6], %s2624_s30, %s2624_s30, %s2625_s16  }
  0x17   :  { %s2412_s23 = scalar_lea.hbm %s3143_s3, 512 }
  0x18   :  { %p2413_p8 = scmp.ne.s32.totalorder %s3143_s3, %s2412_s23  ;;  %p2416_p9 = scmp.lt.u32.totalorder %s2412_s23, %s3143_s3 }
  0x1a   :  { %p2418_p10 = pnand %p2416_p9, %p2413_p8 }
  0x1c   :  { %2421 = shalt.err (!%p2418_p10)
}
  0x1d   :  { %s2422_s28 = scalar_lea.vmem %s2725_s21, 512  ;;  %p2427_p12 = scmp.lt.s32.totalorder %s2725_s21, %s2725_s21 }
  0x1e   :  { %p2423_p11 = scmp.ne.s32.totalorder %s2725_s21, %s2422_s28  ;;  %p2428_p13 = scmp.lt.s32.totalorder %s2422_s28, %s2422_s28 }
  0x20   :  { %p2429_p0 = por %p2428_p13, %p2427_p12 }
  0x22   :  { %p2430_p1 = pnand %p2429_p0, %p2423_p11 }
  0x24   :  { %2433 = shalt.err (!%p2430_p1)
}
  0x25   :  { %73 = dma.hbm_to_vmem [thread:$0]  %s3143_s3, 512, %s2725_s21, [#allocation9], %s2624_s30, %s2624_s30, %s2625_s16  }
  0x26   :  { %s2626_s29 = smov [#allocation11]   ;;  %s2627_s18 = smov [#allocation14]  }
  0x27   :  { %s95_s17 = sshll.u32 %s2626_s29, 4  ;;  %s121_s20 = sshll.u32 %s2627_s18, 4  ;;  %s96_s17 = int_to_ptr.vmem [resolvable:$true] %s95_s17  ;;  %s2762_s20 = int_to_ptr.vmem [resolvable:$true] %s121_s20 }
  0x28   :  { %s2434_s24 = scalar_lea.hbm %s3147_s7, 512 }
  0x29   :  { %p2435_p2 = scmp.ne.s32.totalorder %s3147_s7, %s2434_s24  ;;  %p2438_p3 = scmp.lt.u32.totalorder %s2434_s24, %s3147_s7 }
  0x2b   :  { %p2440_p4 = pnand %p2438_p3, %p2435_p2 }
  0x2d   :  { %2443 = shalt.err (!%p2440_p4)
}
  0x2e   :  { %s2444_s3 = scalar_lea.vmem %s96_s17, 512  ;;  %p2449_p6 = scmp.lt.s32.totalorder %s96_s17, %s96_s17 }
  0x2f   :  { %p2445_p5 = scmp.ne.s32.totalorder %s96_s17, %s2444_s3  ;;  %p2450_p7 = scmp.lt.s32.totalorder %s2444_s3, %s2444_s3 }
  0x31   :  { %p2451_p8 = por %p2450_p7, %p2449_p6 }
  0x33   :  { %p2452_p9 = pnand %p2451_p8, %p2445_p5 }
  0x35   :  { %2455 = shalt.err (!%p2452_p9)
}
  0x36   :  { %101 = dma.hbm_to_vmem [thread:$0]  %s3147_s7, 512, %s96_s17, [#allocation12], %s2624_s30, %s2624_s30, %s2625_s16  }
  0x37   :  { %s2456_s18 = scalar_lea.hbm %s3151_s11, 512 }
  0x38   :  { %p2457_p10 = scmp.ne.s32.totalorder %s3151_s11, %s2456_s18  ;;  %p2460_p11 = scmp.lt.u32.totalorder %s2456_s18, %s3151_s11 }
  0x3a   :  { %p2462_p12 = pnand %p2460_p11, %p2457_p10 }
  0x3c   :  { %2465 = shalt.err (!%p2462_p12)
}
  0x3d   :  { %s2466_s26 = scalar_lea.vmem %s2762_s20, 512  ;;  %p2471_p0 = scmp.lt.s32.totalorder %s2762_s20, %s2762_s20 }
  0x3e   :  { %p2467_p13 = scmp.ne.s32.totalorder %s2762_s20, %s2466_s26  ;;  %p2472_p1 = scmp.lt.s32.totalorder %s2466_s26, %s2466_s26 }
  0x40   :  { %p2473_p2 = por %p2472_p1, %p2471_p0 }
  0x42   :  { %p2474_p3 = pnand %p2473_p2, %p2467_p13 }
  0x44   :  { %2477 = shalt.err (!%p2474_p3)
}
  0x45   :  { %127 = dma.hbm_to_vmem [thread:$0]  %s3151_s11, 512, %s2762_s20, [#allocation15], %s2624_s30, %s2624_s30, %s2625_s16  }
  0x46   :  { %s2628_s27 = smov [#allocation2]   ;;  %s2629_s3 = smov [#allocation7]  }
  0x47   :  { %s31_s28 = sshll.u32 %s2628_s27, 4  ;;  %s55_s21 = sshll.u32 %s2629_s3, 4  ;;  %s32_s28 = int_to_ptr.vmem [resolvable:$true] %s31_s28  ;;  %s2799_s21 = int_to_ptr.vmem [resolvable:$true] %s55_s21 }
  0x48   :  { %s2478_s29 = scalar_lea.hbm %s3140_s0, 256 }
  0x49   :  { %p2479_p4 = scmp.ne.s32.totalorder %s3140_s0, %s2478_s29  ;;  %p2482_p5 = scmp.lt.u32.totalorder %s2478_s29, %s3140_s0 }
  0x4b   :  { %p2484_p6 = pnand %p2482_p5, %p2479_p4 }
  0x4d   :  { %2487 = shalt.err (!%p2484_p6)
}
  0x4e   :  { %s2488_s11 = scalar_lea.vmem %s32_s28, 256  ;;  %p2493_p8 = scmp.lt.s32.totalorder %s32_s28, %s32_s28 }
  0x4f   :  { %p2489_p7 = scmp.ne.s32.totalorder %s32_s28, %s2488_s11  ;;  %p2494_p9 = scmp.lt.s32.totalorder %s2488_s11, %s2488_s11 }
  0x51   :  { %p2495_p10 = por %p2494_p9, %p2493_p8 }
  0x53   :  { %p2496_p11 = pnand %p2495_p10, %p2489_p7 }
  0x55   :  { %2499 = shalt.err (!%p2496_p11)
}
  0x56   :  { %37 = dma.hbm_to_vmem [thread:$0]  %s3140_s0, 256, %s32_s28, [#allocation3], %s2624_s30, %s2624_s30, %s2625_s16  }
  0x57   :  { %s2500_s17 = scalar_lea.hbm %s3142_s2, 256 }
  0x58   :  { %p2501_p12 = scmp.ne.s32.totalorder %s3142_s2, %s2500_s17  ;;  %p2504_p13 = scmp.lt.u32.totalorder %s2500_s17, %s3142_s2 }
  0x5a   :  { %p2506_p0 = pnand %p2504_p13, %p2501_p12 }
  0x5c   :  { %2509 = shalt.err (!%p2506_p0)
}
  0x5d   :  { %s2510_s29 = scalar_lea.vmem %s2799_s21, 256  ;;  %p2515_p2 = scmp.lt.s32.totalorder %s2799_s21, %s2799_s21 }
  0x5e   :  { %p2511_p1 = scmp.ne.s32.totalorder %s2799_s21, %s2510_s29  ;;  %p2516_p3 = scmp.lt.s32.totalorder %s2510_s29, %s2510_s29 }
  0x60   :  { %p2517_p4 = por %p2516_p3, %p2515_p2 }
  0x62   :  { %p2518_p5 = pnand %p2517_p4, %p2511_p1 }
  0x64   :  { %2521 = shalt.err (!%p2518_p5)
}
  0x65   :  { %61 = dma.hbm_to_vmem [thread:$0]  %s3142_s2, 256, %s2799_s21, [#allocation6], %s2624_s30, %s2624_s30, %s2625_s16  }
  0x66   :  { %s2630_s18 = smov [#allocation10]   ;;  %s2631_s23 = smov [#allocation13]  }
  0x67   :  { %s81_s22 = sshll.u32 %s2630_s18, 4  ;;  %s108_s24 = sshll.u32 %s2631_s23, 4  ;;  %s82_s22 = int_to_ptr.vmem [resolvable:$true] %s81_s22  ;;  %s109_s24 = int_to_ptr.vmem [resolvable:$true] %s108_s24 }
  0x68   :  { %s2522_s25 = scalar_lea.hbm %s3145_s5, 512 }
  0x69   :  { %p2523_p6 = scmp.ne.s32.totalorder %s3145_s5, %s2522_s25  ;;  %p2526_p7 = scmp.lt.u32.totalorder %s2522_s25, %s3145_s5 }
  0x6b   :  { %p2528_p8 = pnand %p2526_p7, %p2523_p6 }
  0x6d   :  { %2531 = shalt.err (!%p2528_p8)
}
  0x6e   :  { %s2532_s2 = scalar_lea.vmem %s82_s22, 512  ;;  %p2537_p10 = scmp.lt.s32.totalorder %s82_s22, %s82_s22 }
  0x6f   :  { %p2533_p9 = scmp.ne.s32.totalorder %s82_s22, %s2532_s2  ;;  %p2538_p11 = scmp.lt.s32.totalorder %s2532_s2, %s2532_s2 }
  0x71   :  { %p2539_p12 = por %p2538_p11, %p2537_p10 }
  0x73   :  { %p2540_p13 = pnand %p2539_p12, %p2533_p9 }
  0x75   :  { %2543 = shalt.err (!%p2540_p13)
}
  0x76   :  { %87 = dma.hbm_to_vmem [thread:$0]  %s3145_s5, 512, %s82_s22, [#allocation9], %s2624_s30, %s2624_s30, %s2625_s16  }
  0x77   :  { %s2544_s29 = scalar_lea.hbm %s3148_s8, 16 }
  0x78   :  { %p2545_p0 = scmp.ne.s32.totalorder %s3148_s8, %s2544_s29  ;;  %p2548_p1 = scmp.lt.u32.totalorder %s2544_s29, %s3148_s8 }
  0x7a   :  { %p2550_p2 = pnand %p2548_p1, %p2545_p0 }
  0x7c   :  { %2553 = shalt.err (!%p2550_p2)
}
  0x7d   :  { %s2554_s11 = scalar_lea.vmem %s109_s24, 16  ;;  %s2558_s20 = scalar_lea.vmem %s109_s24, 32 }
  0x7e   :  { %p2555_p3 = scmp.ne.s32.totalorder %s109_s24, %s2554_s11  ;;  %p2559_p4 = scmp.lt.s32.totalorder %s109_s24, %s109_s24 }
  0x7f   :  { %p2560_p5 = scmp.lt.s32.totalorder %s2558_s20, %s2554_s11 }
  0x81   :  { %p2561_p6 = por %p2560_p5, %p2559_p4 }
  0x83   :  { %p2562_p7 = pnand %p2561_p6, %p2555_p3 }
  0x85   :  { %2565 = shalt.err (!%p2562_p7)
}
  0x86   :  { %111 = dma.hbm_to_vmem [thread:$0]  %s3148_s8, 16, %s109_s24, [#allocation12]  }
  0x87   :  { %s2632_s25 = smov [#allocation16]   ;;  %s2566_s27 = scalar_lea.hbm %s3152_s12, 512 }
  0x88   :  { %s133_s26 = sshll.u32 %s2632_s25, 4  ;;  %p2567_p8 = scmp.ne.s32.totalorder %s3152_s12, %s2566_s27  ;;  %s134_s26 = int_to_ptr.vmem [resolvable:$true] %s133_s26 }
  0x89   :  { %p2570_p9 = scmp.lt.u32.totalorder %s2566_s27, %s3152_s12 }
  0x8b   :  { %p2572_p10 = pnand %p2570_p9, %p2567_p8 }
  0x8d   :  { %2575 = shalt.err (!%p2572_p10)
}
  0x8e   :  { %s2576_s19 = scalar_lea.vmem %s134_s26, 512  ;;  %p2581_p12 = scmp.lt.s32.totalorder %s134_s26, %s134_s26 }
  0x8f   :  { %p2577_p11 = scmp.ne.s32.totalorder %s134_s26, %s2576_s19  ;;  %p2582_p13 = scmp.lt.s32.totalorder %s2576_s19, %s2576_s19 }
  0x91   :  { %p2583_p0 = por %p2582_p13, %p2581_p12 }
  0x93   :  { %p2584_p1 = pnand %p2583_p0, %p2577_p11 }
  0x95   :  { %2587 = shalt.err (!%p2584_p1)
}
  0x96   :  { %139 = dma.hbm_to_vmem [thread:$0]  %s3152_s12, 512, %s134_s26, [#allocation15], %s2624_s30, %s2624_s30, %s2625_s16  }
  0x97   :  { %2610 = dma.done.wait [#allocation3], 256  }
  0x98   :  { %2611 = vsyncadd [#allocation3], 4294967040 }
  0x99   :  { %2612 = dma.done.wait [#allocation6], 512  }
  0x9a   :  { %2613 = vsyncadd [#allocation6], 4294966784 }
  0x9b   :  { %2614 = dma.done.wait [#allocation9], 1024  }
  0x9c   :  { %2615 = vsyncadd [#allocation9], 4294966272 }
  0x9d   :  { %2616 = dma.done.wait [#allocation12], 528  }
  0x9e   :  { %2617 = vsyncadd [#allocation12], 4294966768 }
  0x9f   :  { %2618 = dma.done.wait [#allocation15], 1024  }
  0xa0   :  { %2619 = vsyncadd [#allocation15], 4294966272  ;;  %v269_v0 = vld [vmem:[#allocation10] sm:$0xff]  ;;  %v270_v1 = vld [vmem:[#allocation10 + $0x8] sm:$0xff]  ;;  %vm187_vm0 = vcmask 261120   ;;  %v2633_v16 = vmov 0.0  }
  0xa1   :  { %v271_v2 = vld [vmem:[#allocation10 + $0x10] sm:$0xff]  ;;  %v2279_v3 = vpack.c.bf16 %v270_v1, %v269_v0  ;;  %v272_v4 = vld [vmem:[#allocation10 + $0x18] sm:$0xff]  ;;  %v176_v5 = vld [vmem:[#allocation8] sm:$0xff]  ;;  %vm2634_vm1 = vmmov 0   ;;  %vm380_vm2 = vcmask 64512   ;;  %vm507_vm5 = vcmask 1043456  }
  0xa2   :  { %v177_v6 = vld [vmem:[#allocation8 + $0x8] sm:$0xff]  ;;  %v2283_v7 = vpack.c.bf16 %v272_v4, %v271_v2  ;;  %v174_v9 = vld [vmem:[#allocation5] sm:$0xff]  ;;  %v178_v10 = vld [vmem:[#allocation8 + $0x10] sm:$0xff]  ;;  %s2637_s18 = smov 88   ;;  %s2638_s23 = smov 112  }
  0xa3   :  { %v2271_v8 = vpack.c.bf16 %v177_v6, %v176_v5  ;;  %2280 = vmatprep.subr.bf16.mxu1 %v2279_v3  ;;  %2119 = vmatprep.mubr.msk.f32.mxu1 %vm187_vm0, %v174_v9  ;;  %v179_v11 = vld [vmem:[#allocation8 + $0x18] sm:$0xff]  ;;  %v2879_v12 = vld [vmem:[#allocation2] sm:$0xff]  ;;  %v175_v14 = vld [vmem:[#allocation5 + $0x8] sm:$0xff]  ;;  %s2639_s11 = smov 80   ;;  %s2640_s20 = smov 104  }
  0xa4   :  { %2282 = vmatpush3.bf16.msra.mxu1 %v2279_v3  ;;  %v2275_v13 = vpack.c.bf16 %v179_v11, %v178_v10  ;;  %2108 = vmatprep.mubr.msk.f32.mxu0 %vm187_vm0, %v2879_v12  ;;  %v2883_v15 = vld [vmem:[#allocation2 + $0x8] sm:$0xff]  ;;  %v1987_v17 = vld [vmem:[%s3146_s6] ss:$0 sm:$0xff]  ;;  %s2636_s6 = smov 120   ;;  %v365_v59 = vld [vmem:[#allocation11] sm:$0xff]  ;;  %s2641_s5 = smov 72  }
  0xa5   :  { %2272 = vmatprep.subr.bf16.mxu0 %v2271_v8  ;;  %2284 = vmatprep.subr.bf16.mxu1 %v2283_v7  ;;  %v1984_v23 = vld [vmem:[%s3144_s4] ss:$0 sm:$0xff]  ;;  %v2924_v34 = vld [vmem:[#allocation7 + $0x8] sm:$0xff]  ;;  %s2635_s4 = smov 96   ;;  %s2644_s29 = smov [#allocation17]  }
  0xa6   :  { %2274 = vmatpush3.bf16.msra.mxu0 %v2271_v8  ;;  %v2922_v33 = vld [vmem:[#allocation7] sm:$0xff]  ;;  %vm364_vm4 = vcmp.eq.f32.partialorder %v2924_v34, 0.0  ;;  %s1968_s0 = sshll.u32 %s2644_s29, 4  ;;  %s1969_s0 = int_to_ptr.vmem [resolvable:$true] %s1968_s0 }
  0xa7   :  { %2276 = vmatprep.subr.bf16.mxu0 %v2275_v13  ;;  %vm363_vm3 = vcmp.eq.f32.partialorder %v2922_v33, 0.0  ;;  %v1606_v33 = vld [vmem:[%s3149_s9] sm:$0xff]  ;;  %s2588_s28 = scalar_lea.vmem %s1969_s0, 256  ;;  %p2593_p3 = scmp.lt.s32.totalorder %s1969_s0, %s1969_s0 }
  0xa8   :  { %2286 = vmatpush3.bf16.msra.mxu1 %v2283_v7  ;;  %p2589_p2 = scmp.ne.s32.totalorder %s1969_s0, %s2588_s28  ;;  %p2594_p4 = scmp.lt.s32.totalorder %s2588_s28, %s2588_s28 }
  0xa9   :  { %2128 = vmatprep.subr.bf16.mxu1 %v2633_v16 }
  0xaa   :  { %2278 = vmatpush3.bf16.msra.mxu0 %v2275_v13  ;;  %p2595_p5 = por %p2594_p4, %p2593_p3 }
  0xab   :  { %2120 = vmatmul.mubr.msk.f32.vlgmr.msra.gmra.mrb[0].mxu1 %vm187_vm0, %v175_v14  ;;  %2122 = vmatprep.subr.bf16.mxu0 %v2633_v16 }
  0xac   :  { %2130 = vmatprep.mubr.msk.bf16.mxu1 %vm2634_vm1, %v2633_v16  ;;  %p2596_p6 = pnand %p2595_p5, %p2589_p2 }
  0xad   :  { %2109 = vmatmul.mubr.msk.f32.vlgmr.msra.gmra.mrb[0].mxu0 %vm187_vm0, %v2883_v15 }
  0xae   :  { %2124 = vmatprep.mubr.msk.bf16.mxu0 %vm2634_vm1, %v2633_v16 }
 0x17e   :  { %v2121_v18 = vpop.f32.mrb[0].mxu1 }
 0x17f   :  { %v358_v19 = vadd.f32 %v2121_v18, %v1987_v17  ;;  %v352_v20 = vpop.f32.mrb[1].mxu1 }
 0x180   :  { %v2110_v21 = vpop.f32.mrb[0].mxu0  ;;  %v353_v22 = vadd.f32 %v1987_v17, %v352_v20 }
 0x181   :  { %v260_v24 = vpop.f32.mrb[1].mxu0  ;;  %v2900_v25 = vpack.c.bf16 %v358_v19, %v358_v19  ;;  %v266_v28 = vadd.f32 %v2110_v21, %v1984_v23 }
 0x182   :  { %v2902_v26 = vpack.c.bf16 %v353_v22, %v353_v22  ;;  %v261_v30 = vadd.f32 %v1984_v23, %v260_v24 }
 0x183   :  { %v431_v27 = vsel %vm380_vm2, %v2900_v25, 0  ;;  %v2910_v31 = vpack.c.bf16 %v266_v28, %v266_v28 }
 0x184   :  { %2129 = vmatpush3.bf16.xpose.msra.mxu1 %v431_v27  ;;  %v385_v29 = vsel %vm380_vm2, %v2902_v26, 0  ;;  %v2912_v32 = vpack.c.bf16 %v261_v30, %v261_v30 }
 0x185   :  { %2123 = vmatpush3.bf16.xpose.msra.mxu0 %v385_v29  ;;  %2140 = vmatprep.subr.bf16.mxu1 %v2633_v16 }
 0x186   :  { %2134 = vmatprep.subr.bf16.mxu0 %v2633_v16 }
 0x18b   :  { %2131 = vmatmul.mubr.msk.bf16.vlgmr.msra.gmra.mrb[4].mxu1 %vm380_vm2, %v2910_v31 }
 0x18c   :  { %2125 = vmatmul.mubr.msk.bf16.vlgmr.msra.gmra.mrb[4].mxu0 %vm380_vm2, %v2912_v32  ;;  %2142 = vmatprep.mubr.msk.bf16.mxu1 %vm2634_vm1, %v2633_v16 }
 0x18d   :  { %2136 = vmatprep.mubr.msk.bf16.mxu0 %vm2634_vm1, %v2633_v16 }
 0x25e   :  { %v467_v35 = vpop.f32.mrb[4].mxu1 }
 0x25f   :  { %v421_v36 = vpop.f32.mrb[4].mxu0  ;;  %v2132_v37 = vpop.f32.mrb[5].mxu1  ;;  %v474_v44 = vsel %vm364_vm4, -1e+30, %v467_v35 }
 0x260   :  { %v473_v38 = vsel %vm363_vm3, -1e+30, %v421_v36  ;;  %v2126_v39 = vpop.f32.mrb[5].mxu0  ;;  %v470_v40 = vpop.f32.mrb[6].mxu1  ;;  %v478_v46 = vsel %vm380_vm2, %v474_v44, -inf }
 0x261   :  { %v424_v41 = vpop.f32.mrb[6].mxu0  ;;  %v2133_v42 = vpop.f32.mrb[7].mxu1  ;;  %v475_v43 = vsel %vm380_vm2, %v473_v38, -inf }
 0x262   :  { %476 = vmax.xlane.f32.xlu0 %v475_v43  ;;  %v2127_v45 = vpop.f32.mrb[7].mxu0 }
 0x266   :  { %479 = vmax.xlane.f32.xlu0 %v478_v46 }
 0x27c   :  { %502 = vrot.lane.b32.xlu0 %v2902_v26, %s2635_s4 }
 0x280   :  { %737 = vrot.lane.b32.xlu0 %v2900_v25, %s2636_s6 }
 0x2ef   :  { %v477_v47 = vpop.xlane.xlu0 %476 }
 0x2f0   :  { %v481_v48 = vsub.f32 %v473_v38, %v477_v47 }
 0x2f2   :  { %v483_v51 = vmul.f32 1.442695, %v481_v48 }
 0x2f3   :  { %v480_v49 = vpop.xlane.xlu0 %479 }
 0x2f4   :  { %v482_v50 = vsub.f32 %v474_v44, %v480_v49 }
 0x2f6   :  { %v485_v52 = vmul.f32 1.442695, %v482_v50 }
 0x2f7   :  { %v503_v53 = vpop.permute.xlu0 %502 }
 0x2f8   :  { %2342 = vpow2.f32 %v485_v52  ;;  %v509_v54 = vsel %vm507_vm5, %v503_v53, 0 }
 0x2f9   :  { %2135 = vmatpush3.bf16.msra.mxu0 %v509_v54  ;;  %2344 = vpow2.f32 %v483_v51 }
 0x2fa   :  { %2146 = vmatprep.subr.mxu0 %v365_v59 }
 0x2fb   :  { %v738_v17 = vpop.permute.xlu0 %737 }
 0x2fc   :  { %v743_v21 = vsel %vm380_vm2, %v738_v17, 0 }
 0x302   :  { %v2343_v55 = vpop.eup %2342 }
 0x303   :  { %v490_v56 = vsel %vm380_vm2, %v2343_v55, 0.0  ;;  %v2345_v57 = vpop.eup %2344 }
 0x304   :  { %491 = vadd.xlane.f32.xlu1 %v490_v56  ;;  %v487_v58 = vsel %vm380_vm2, %v2345_v57, 0.0 }
 0x308   :  { %488 = vadd.xlane.f32.xlu1 %v487_v58 }
 0x319   :  { %552 = vrot.lane.b32.xlu1 %v2900_v25, %s2635_s4 }
 0x31d   :  { %686 = vrot.lane.b32.xlu1 %v2902_v26, %s2636_s6 }
 0x321   :  { %684 = vrot.lane.b32.xlu1 %v2912_v32, %s2636_s6 }
 0x325   :  { %735 = vrot.lane.b32.xlu1 %v2910_v31, %s2636_s6 }
 0x391   :  { %v492_v60 = vpop.xlane.xlu1 %491 }
 0x392   :  { %2346 = vrcp.f32 %v492_v60 }
 0x395   :  { %v489_v61 = vpop.xlane.xlu1 %488 }
 0x396   :  { %2348 = vrcp.f32 %v489_v61 }
 0x399   :  { %v553_v62 = vpop.permute.xlu1 %552 }
 0x39a   :  { %v558_v63 = vsel %vm507_vm5, %v553_v62, 0 }
 0x39b   :  { %2141 = vmatpush3.bf16.msra.mxu1 %v558_v63 }
 0x39c   :  { %v2347_v0 = vpop.eup %2346  ;;  %2151 = vmatprep.subr.bf16.mxu1 %v2633_v16 }
 0x39d   :  { %v496_v1 = vmul.f32 %v2347_v0, %v2343_v55  ;;  %v687_v4 = vpop.permute.xlu1 %686 }
 0x39e   :  { %v692_v7 = vsel %vm380_vm2, %v687_v4, 0 }
 0x39f   :  { %v498_v2 = vsel %vm364_vm4, 0.0, %v496_v1 }
 0x3a0   :  { %v2349_v3 = vpop.eup %2348  ;;  %v500_v5 = vpack.c.bf16 %v498_v2, %v498_v2 }
 0x3a1   :  { %v495_v6 = vmul.f32 %v2349_v3, %v2345_v57  ;;  %v685_v10 = vpop.permute.xlu1 %684 }
 0x3a2   :  { %2143 = vmatmul.mubr.msk.bf16.vlgmr.msra.gmra.mrb[8].mxu1 %vm380_vm2, %v500_v5 }
 0x3a3   :  { %v497_v8 = vsel %vm363_vm3, 0.0, %v495_v6  ;;  %2153 = vmatprep.mubr.msk.bf16.mxu1 %vm2634_vm1, %v2633_v16 }
 0x3a4   :  { %2152 = vmatpush3.bf16.xpose.msra.mxu1 %v692_v7  ;;  %v499_v9 = vpack.c.bf16 %v497_v8, %v497_v8 }
 0x3a5   :  { %2163 = vmatprep.subr.bf16.mxu1 %v2633_v16  ;;  %v736_v36 = vpop.permute.xlu1 %735 }
 0x3a6   :  { %2137 = vmatmul.mubr.msk.bf16.vlgmr.msra.gmra.mrb[8].mxu0 %vm380_vm2, %v499_v9 }
 0x3a7   :  { %2147 = vmatpush3.msra.mxu0 %v365_v59 }
 0x3a8   :  { %2157 = vmatprep.subr.bf16.mxu0 %v2633_v16 }
 0x3ab   :  { %2154 = vmatmul.mubr.msk.bf16.vlgmr.msra.gmra.mrb[12].mxu1 %vm380_vm2, %v685_v10 }
 0x3ac   :  { %2165 = vmatprep.mubr.msk.bf16.mxu1 %vm2634_vm1, %v2633_v16 }
 0x475   :  { %v594_v11 = vpop.f32.mrb[8].mxu1 }
 0x476   :  { %v2144_v13 = vpop.f32.mrb[9].mxu1 }
 0x477   :  { %v597_v14 = vpop.f32.mrb[10].mxu1 }
 0x478   :  { %v2145_v18 = vpop.f32.mrb[11].mxu1 }
 0x479   :  { %v545_v19 = vpop.f32.mrb[8].mxu0 }
 0x47a   :  { %v2138_v20 = vpop.f32.mrb[9].mxu0  ;;  %2148 = vmatprep.mubr.msk.f32.mxu0 %vm380_vm2, %v545_v19 }
 0x47b   :  { %v548_v22 = vpop.f32.mrb[10].mxu0  ;;  %2149 = vmatmul.mubr.msk.f32.vlgmr.msra.gmra.mrb[2].mxu0 %vm380_vm2, %v594_v11 }
 0x47c   :  { %2158 = vmatpush3.bf16.xpose.msra.mxu0 %v743_v21  ;;  %v2139_v23 = vpop.f32.mrb[11].mxu0  ;;  %2159 = vmatprep.mubr.msk.bf16.mxu0 %vm2634_vm1, %v2633_v16 }
 0x47d   :  { %2169 = vmatprep.subr.bf16.mxu0 %v2633_v16 }
 0x47e   :  { %v728_v24 = vpop.f32.mrb[12].mxu1 }
 0x47f   :  { %v785_v27 = vsel %vm363_vm3, -1e+30, %v728_v24  ;;  %v2155_v28 = vpop.f32.mrb[13].mxu1 }
 0x480   :  { %v731_v29 = vpop.f32.mrb[14].mxu1  ;;  %v787_v30 = vsel %vm380_vm2, %v785_v27, -inf }
 0x481   :  { %788 = vmax.xlane.f32.xlu0 %v787_v30  ;;  %v2156_v35 = vpop.f32.mrb[15].mxu1 }
 0x482   :  { %v366_v35 = vld [vmem:[#allocation11 + $0x8] sm:$0xff] }
 0x483   :  { %2160 = vmatmul.mubr.msk.bf16.vlgmr.msra.gmra.mrb[12].mxu0 %vm380_vm2, %v736_v36 }
 0x484   :  { %2171 = vmatprep.mubr.msk.bf16.mxu0 %vm2634_vm1, %v2633_v16 }
 0x497   :  { %813 = vrot.lane.b32.xlu0 %v2902_v26, %s2637_s18 }
 0x49b   :  { %992 = vrot.lane.b32.xlu0 %v2912_v32, %s2638_s23 }
 0x49f   :  { %1042 = vrot.lane.b32.xlu0 %v2910_v31, %s2638_s23 }
 0x50e   :  { %v789_v37 = vpop.xlane.xlu0 %788 }
 0x50f   :  { %v793_v38 = vsub.f32 %v785_v27, %v789_v37 }
 0x511   :  { %v795_v39 = vmul.f32 1.442695, %v793_v38 }
 0x512   :  { %v814_v40 = vpop.permute.xlu0 %813 }
 0x513   :  { %2350 = vpow2.f32 %v795_v39  ;;  %v819_v41 = vsel %vm507_vm5, %v814_v40, 0 }
 0x514   :  { %2164 = vmatpush3.bf16.msra.mxu1 %v819_v41 }
 0x515   :  { %2180 = vmatprep.subr.bf16.mxu1 %v2633_v16 }
 0x516   :  { %v993_v58 = vpop.permute.xlu0 %992 }
 0x51a   :  { %v1043_v60 = vpop.permute.xlu0 %1042 }
 0x51d   :  { %v2351_v42 = vpop.eup %2350 }
 0x51e   :  { %v799_v43 = vsel %vm380_vm2, %v2351_v42, 0.0 }
 0x51f   :  { %800 = vadd.xlane.f32.xlu1 %v799_v43 }
 0x530   :  { %994 = vrot.lane.b32.xlu1 %v2902_v26, %s2638_s23 }
 0x534   :  { %1044 = vrot.lane.b32.xlu1 %v2900_v25, %s2638_s23 }
 0x556   :  { %v779_v44 = vpop.f32.mrb[12].mxu0 }
 0x557   :  { %v786_v45 = vsel %vm364_vm4, -1e+30, %v779_v44  ;;  %v2161_v46 = vpop.f32.mrb[13].mxu0 }
 0x558   :  { %v782_v47 = vpop.f32.mrb[14].mxu0  ;;  %v790_v48 = vsel %vm380_vm2, %v786_v45, -inf }
 0x559   :  { %791 = vmax.xlane.f32.xlu1 %v790_v48  ;;  %v2162_v49 = vpop.f32.mrb[15].mxu0 }
 0x5ac   :  { %v801_v50 = vpop.xlane.xlu1 %800 }
 0x5ad   :  { %2352 = vrcp.f32 %v801_v50 }
 0x5b0   :  { %v995_v53 = vpop.permute.xlu1 %994 }
 0x5b1   :  { %v1000_v56 = vsel %vm380_vm2, %v995_v53, 0 }
 0x5b4   :  { %v1045_v57 = vpop.permute.xlu1 %1044 }
 0x5b5   :  { %v1050_v59 = vsel %vm380_vm2, %v1045_v57, 0 }
 0x5b7   :  { %v2353_v51 = vpop.eup %2352 }
 0x5b8   :  { %v807_v52 = vmul.f32 %v2353_v51, %v2351_v42 }
 0x5ba   :  { %v809_v54 = vsel %vm363_vm3, 0.0, %v807_v52 }
 0x5bb   :  { %v811_v55 = vpack.c.bf16 %v809_v54, %v809_v54 }
 0x5bd   :  { %2166 = vmatmul.mubr.msk.bf16.vlgmr.msra.gmra.mrb[16].mxu1 %vm380_vm2, %v811_v55 }
 0x5be   :  { %2181 = vmatpush3.bf16.xpose.msra.mxu1 %v1000_v56  ;;  %2182 = vmatprep.mubr.msk.bf16.mxu1 %vm2634_vm1, %v2633_v16 }
 0x5bf   :  { %2186 = vmatprep.subr.bf16.mxu1 %v2633_v16 }
 0x5c5   :  { %2183 = vmatmul.mubr.msk.bf16.vlgmr.msra.gmra.mrb[20].mxu1 %vm380_vm2, %v993_v58 }
 0x5c6   :  { %2187 = vmatpush3.bf16.xpose.msra.mxu1 %v1050_v59  ;;  %2188 = vmatprep.mubr.msk.bf16.mxu1 %vm2634_vm1, %v2633_v16 }
 0x5c7   :  { %2198 = vmatprep.subr.bf16.mxu1 %v2633_v16 }
 0x5cd   :  { %2189 = vmatmul.mubr.msk.bf16.vlgmr.msra.gmra.mrb[24].mxu1 %vm380_vm2, %v1043_v60 }
 0x5ce   :  { %2200 = vmatprep.mubr.msk.bf16.mxu1 %vm2634_vm1, %v2633_v16 }
 0x5e6   :  { %v792_v61 = vpop.xlane.xlu1 %791 }
 0x5e7   :  { %v794_v62 = vsub.f32 %v786_v45, %v792_v61 }
 0x5e9   :  { %v797_v63 = vmul.f32 1.442695, %v794_v62 }
 0x5eb   :  { %2354 = vpow2.f32 %v797_v63 }
 0x5f5   :  { %v2355_v0 = vpop.eup %2354 }
 0x5f6   :  { %v802_v1 = vsel %vm380_vm2, %v2355_v0, 0.0 }
 0x5f7   :  { %803 = vadd.xlane.f32.xlu0 %v802_v1  ;;  %v367_v1 = vld [vmem:[#allocation11 + $0x10] sm:$0xff] }
 0x60d   :  { %861 = vrot.lane.b32.xlu0 %v2900_v25, %s2637_s18 }
 0x611   :  { %1168 = vrot.lane.b32.xlu0 %v2900_v25, %s2639_s11 }
 0x615   :  { %1301 = vrot.lane.b32.xlu0 %v2902_v26, %s2640_s20 }
 0x619   :  { %1351 = vrot.lane.b32.xlu0 %v2900_v25, %s2640_s20 }
 0x61d   :  { %1299 = vrot.lane.b32.xlu0 %v2912_v32, %s2640_s20 }
 0x684   :  { %v804_v2 = vpop.xlane.xlu0 %803 }
 0x685   :  { %2356 = vrcp.f32 %v804_v2 }
 0x688   :  { %v862_v3 = vpop.permute.xlu0 %861 }
 0x689   :  { %v867_v4 = vsel %vm507_vm5, %v862_v3, 0 }
 0x68a   :  { %2170 = vmatpush3.bf16.msra.mxu0 %v867_v4 }
 0x68b   :  { %2175 = vmatprep.subr.mxu0 %v366_v35 }
 0x68c   :  { %v1169_v5 = vpop.permute.xlu0 %1168 }
 0x68d   :  { %v1174_v6 = vsel %vm507_vm5, %v1169_v5, 0 }
 0x68e   :  { %2199 = vmatpush3.bf16.msra.mxu1 %v1174_v6 }
 0x68f   :  { %v2357_v7 = vpop.eup %2356  ;;  %2209 = vmatprep.subr.bf16.mxu1 %v2633_v16 }
 0x690   :  { %v808_v8 = vmul.f32 %v2357_v7, %v2355_v0  ;;  %v855_v9 = vpop.f32.mrb[16].mxu1  ;;  %v1302_v58 = vpop.permute.xlu0 %1301 }
 0x691   :  { %v2167_v10 = vpop.f32.mrb[17].mxu1  ;;  %v1307_v62 = vsel %vm380_vm2, %v1302_v58, 0 }
 0x692   :  { %v858_v11 = vpop.f32.mrb[18].mxu1  ;;  %v810_v32 = vsel %vm364_vm4, 0.0, %v808_v8 }
 0x693   :  { %v2168_v13 = vpop.f32.mrb[19].mxu1  ;;  %v812_v14 = vpack.c.bf16 %v810_v32, %v810_v32 }
 0x694   :  { %v1352_v63 = vpop.permute.xlu0 %1351 }
 0x695   :  { %2172 = vmatmul.mubr.msk.bf16.vlgmr.msra.gmra.mrb[16].mxu0 %vm380_vm2, %v812_v14  ;;  %v1357_v7 = vsel %vm380_vm2, %v1352_v63, 0 }
 0x696   :  { %2177 = vmatprep.mubr.msk.f32.mxu0 %vm380_vm2, %v855_v9  ;;  %2176 = vmatpush3.msra.mxu0 %v366_v35 }
 0x697   :  { %2192 = vmatprep.subr.bf16.mxu0 %v2633_v16 }
 0x698   :  { %v1036_v17 = vpop.f32.mrb[20].mxu1  ;;  %v1300_v0 = vpop.permute.xlu0 %1299 }
 0x699   :  { %v1092_v18 = vsel %vm363_vm3, -1e+30, %v1036_v17  ;;  %v2184_v19 = vpop.f32.mrb[21].mxu1 }
 0x69a   :  { %v1039_v20 = vpop.f32.mrb[22].mxu1  ;;  %v1094_v21 = vsel %vm380_vm2, %v1092_v18, -inf }
 0x69b   :  { %v2185_v22 = vpop.f32.mrb[23].mxu1  ;;  %1095 = vmax.xlane.f32.xlu1 %v1094_v21 }
 0x6a0   :  { %v1086_v23 = vpop.f32.mrb[24].mxu1 }
 0x6a1   :  { %v1093_v24 = vsel %vm364_vm4, -1e+30, %v1086_v23  ;;  %v2190_v27 = vpop.f32.mrb[25].mxu1 }
 0x6a2   :  { %v1089_v28 = vpop.f32.mrb[26].mxu1  ;;  %v1097_v29 = vsel %vm380_vm2, %v1093_v24, -inf }
 0x6a3   :  { %v2191_v30 = vpop.f32.mrb[27].mxu1  ;;  %1098 = vmax.xlane.f32.xlu1 %v1097_v29 }
 0x728   :  { %v1096_v36 = vpop.xlane.xlu1 %1095 }
 0x729   :  { %v1100_v37 = vsub.f32 %v1092_v18, %v1096_v36 }
 0x72b   :  { %v1102_v38 = vmul.f32 1.442695, %v1100_v37 }
 0x72d   :  { %2358 = vpow2.f32 %v1102_v38 }
 0x730   :  { %v1099_v39 = vpop.xlane.xlu1 %1098 }
 0x731   :  { %v1101_v40 = vsub.f32 %v1093_v24, %v1099_v39 }
 0x733   :  { %v1104_v41 = vmul.f32 1.442695, %v1101_v40 }
 0x735   :  { %2360 = vpow2.f32 %v1104_v41 }
 0x737   :  { %v2359_v42 = vpop.eup %2358 }
 0x738   :  { %v1106_v43 = vsel %vm380_vm2, %v2359_v42, 0.0 }
 0x739   :  { %1107 = vadd.xlane.f32.xlu1 %v1106_v43 }
 0x73f   :  { %v2361_v44 = vpop.eup %2360 }
 0x740   :  { %v1109_v45 = vsel %vm380_vm2, %v2361_v44, 0.0 }
 0x741   :  { %1110 = vadd.xlane.f32.xlu1 %v1109_v45 }
 0x752   :  { %1120 = vrot.lane.b32.xlu1 %v2902_v26, %s2639_s11 }
 0x756   :  { %1349 = vrot.lane.b32.xlu1 %v2910_v31, %s2640_s20 }
 0x768   :  { %v903_v46 = vpop.f32.mrb[16].mxu0 }
 0x769   :  { %v2173_v47 = vpop.f32.mrb[17].mxu0  ;;  %2178 = vmatmul.mubr.msk.f32.vlgmr.msra.gmra.mrb[2].mxu0 %vm380_vm2, %v903_v46 }
 0x76a   :  { %v906_v48 = vpop.f32.mrb[18].mxu0  ;;  %2194 = vmatprep.mubr.msk.bf16.mxu0 %vm2634_vm1, %v2633_v16 }
 0x76b   :  { %v2174_v49 = vpop.f32.mrb[19].mxu0 }
 0x7c6   :  { %v1108_v50 = vpop.xlane.xlu1 %1107 }
 0x7c7   :  { %2362 = vrcp.f32 %v1108_v50 }
 0x7ce   :  { %v1111_v51 = vpop.xlane.xlu1 %1110 }
 0x7cf   :  { %2364 = vrcp.f32 %v1111_v51 }
 0x7d1   :  { %v2363_v52 = vpop.eup %2362 }
 0x7d2   :  { %v1114_v53 = vmul.f32 %v2363_v52, %v2359_v42  ;;  %v1121_v54 = vpop.permute.xlu1 %1120 }
 0x7d3   :  { %v1126_v55 = vsel %vm507_vm5, %v1121_v54, 0  ;;  %v1607_v54 = vld [vmem:[%s3149_s9 + $0x8] sm:$0xff] }
 0x7d4   :  { %2193 = vmatpush3.bf16.msra.mxu0 %v1126_v55  ;;  %v1116_v31 = vsel %vm363_vm3, 0.0, %v1114_v53  ;;  %v368_v53 = vld [vmem:[#allocation11 + $0x18] sm:$0xff]  ;;  %v2287_v34 = vpack.c.bf16 %v1607_v54, %v1606_v33  ;;  %v1609_v55 = vld [vmem:[%s3149_s9 + $0x18] sm:$0xff] }
 0x7d5   :  { %v1118_v56 = vpack.c.bf16 %v1116_v31, %v1116_v31  ;;  %2204 = vmatprep.subr.mxu0 %v367_v1 }
 0x7d6   :  { %v1350_v11 = vpop.permute.xlu1 %1349 }
 0x7d7   :  { %2195 = vmatmul.mubr.msk.bf16.vlgmr.msra.gmra.mrb[20].mxu0 %vm380_vm2, %v1118_v56  ;;  %v1692_v56 = vld [vmem:[#allocation14] sm:$0xff] }
 0x7d8   :  { %2205 = vmatpush3.msra.mxu0 %v367_v1 }
 0x7d9   :  { %v2365_v57 = vpop.eup %2364  ;;  %2215 = vmatprep.subr.bf16.mxu0 %v2633_v16 }
 0x7da   :  { %v1115_v59 = vmul.f32 %v2365_v57, %v2361_v44  ;;  %v1693_v57 = vld [vmem:[#allocation14 + $0x8] sm:$0xff] }
 0x7db   :  { %v2295_v58 = vpack.c.bf16 %v1693_v57, %v1692_v56 }
 0x7dc   :  { %v1117_v60 = vsel %vm364_vm4, 0.0, %v1115_v59 }
 0x7dd   :  { %v1119_v61 = vpack.c.bf16 %v1117_v60, %v1117_v60 }
 0x7df   :  { %2201 = vmatmul.mubr.msk.bf16.vlgmr.msra.gmra.mrb[28].mxu1 %vm380_vm2, %v1119_v61 }
 0x7e0   :  { %2210 = vmatpush3.bf16.xpose.msra.mxu1 %v1307_v62  ;;  %2211 = vmatprep.mubr.msk.bf16.mxu1 %vm2634_vm1, %v2633_v16 }
 0x7e1   :  { %2221 = vmatprep.subr.bf16.mxu1 %v2633_v16 }
 0x7e7   :  { %2212 = vmatmul.mubr.msk.bf16.vlgmr.msra.gmra.mrb[32].mxu1 %vm380_vm2, %v1300_v0 }
 0x7e8   :  { %2223 = vmatprep.mubr.msk.bf16.mxu1 %vm2634_vm1, %v2633_v16 }
 0x8aa   :  { %v1162_v2 = vpop.f32.mrb[20].mxu0 }
 0x8ab   :  { %v2196_v3 = vpop.f32.mrb[21].mxu0  ;;  %2206 = vmatprep.mubr.msk.f32.mxu0 %vm380_vm2, %v1162_v2 }
 0x8ac   :  { %v1165_v4 = vpop.f32.mrb[22].mxu0  ;;  %v1694_v3 = vld [vmem:[#allocation14 + $0x10] sm:$0xff] }
 0x8ad   :  { %v2197_v5 = vpop.f32.mrb[23].mxu0  ;;  %v1695_v4 = vld [vmem:[#allocation14 + $0x18] sm:$0xff] }
 0x8ae   :  { %v2299_v5 = vpack.c.bf16 %v1695_v4, %v1694_v3 }
 0x8b2   :  { %v1210_v6 = vpop.f32.mrb[28].mxu1 }
 0x8b3   :  { %v2202_v8 = vpop.f32.mrb[29].mxu1  ;;  %2207 = vmatmul.mubr.msk.f32.vlgmr.msra.gmra.mrb[2].mxu0 %vm380_vm2, %v1210_v6 }
 0x8b4   :  { %2216 = vmatpush3.bf16.xpose.msra.mxu0 %v1357_v7  ;;  %v1213_v9 = vpop.f32.mrb[30].mxu1  ;;  %2217 = vmatprep.mubr.msk.bf16.mxu0 %vm2634_vm1, %v2633_v16  ;;  %v1990_v7 = vld [vmem:[#allocation13] ss:$0 sm:$0xff] }
 0x8b5   :  { %v2203_v10 = vpop.f32.mrb[31].mxu1  ;;  %2227 = vmatprep.subr.bf16.mxu0 %v2633_v16 }
 0x8ba   :  { %v1343_v32 = vpop.f32.mrb[32].mxu1 }
 0x8bb   :  { %v1399_v13 = vsel %vm363_vm3, -1e+30, %v1343_v32  ;;  %2218 = vmatmul.mubr.msk.bf16.vlgmr.msra.gmra.mrb[24].mxu0 %vm380_vm2, %v1350_v11  ;;  %v2213_v14 = vpop.f32.mrb[33].mxu1  ;;  %v1799_v32 = vld [vmem:[#allocation16] sm:$0xff] }
 0x8bc   :  { %v1346_v17 = vpop.f32.mrb[34].mxu1  ;;  %v1401_v18 = vsel %vm380_vm2, %v1399_v13, -inf  ;;  %2229 = vmatprep.mubr.msk.bf16.mxu0 %vm2634_vm1, %v2633_v16  ;;  %v1801_v14 = vld [vmem:[#allocation16 + $0x10] sm:$0xff] }
 0x8bd   :  { %1402 = vmax.xlane.f32.xlu0 %v1401_v18  ;;  %v2214_v19 = vpop.f32.mrb[35].mxu1  ;;  %v1802_v18 = vld [vmem:[#allocation16 + $0x18] sm:$0xff] }
 0x8be   :  { %v2307_v19 = vpack.c.bf16 %v1802_v18, %v1801_v14  ;;  %v2025_v14 = vld [vmem:[%s3154_s14] ss:$0 sm:$0xff] }
 0x94a   :  { %v1403_v20 = vpop.xlane.xlu0 %1402 }
 0x94b   :  { %v1407_v21 = vsub.f32 %v1399_v13, %v1403_v20  ;;  %v1800_v13 = vld [vmem:[#allocation16 + $0x8] sm:$0xff] }
 0x94c   :  { %v2303_v17 = vpack.c.bf16 %v1800_v13, %v1799_v32  ;;  %v2015_v20 = vld [vmem:[%s3150_s10] ss:$0 sm:$0xff]  ;;  %s2643_s10 = smov 64  }
 0x94d   :  { %v1409_v22 = vmul.f32 1.442695, %v1407_v21  ;;  %v2024_v32 = vld [vmem:[%s3153_s13] ss:$0 sm:$0xff] }
 0x94f   :  { %2366 = vpow2.f32 %v1409_v22 }
 0x959   :  { %v2367_v23 = vpop.eup %2366 }
 0x95a   :  { %v1413_v24 = vsel %vm380_vm2, %v2367_v23, 0.0 }
 0x95b   :  { %1414 = vadd.xlane.f32.xlu0 %v1413_v24 }
 0x98e   :  { %v1393_v27 = vpop.f32.mrb[24].mxu0 }
 0x98f   :  { %v1400_v28 = vsel %vm364_vm4, -1e+30, %v1393_v27  ;;  %v2219_v29 = vpop.f32.mrb[25].mxu0 }
 0x990   :  { %v1396_v30 = vpop.f32.mrb[26].mxu0  ;;  %v1404_v35 = vsel %vm380_vm2, %v1400_v28, -inf }
 0x991   :  { %1405 = vmax.xlane.f32.xlu1 %v1404_v35  ;;  %v2220_v16 = vpop.f32.mrb[27].mxu0 }
 0x9a2   :  { %1475 = vrot.lane.b32.xlu1 %v2900_v25, %s2641_s5 }
 0x9e8   :  { %v1415_v43 = vpop.xlane.xlu0 %1414 }
 0xa1e   :  { %v1406_v36 = vpop.xlane.xlu1 %1405 }
 0xa1f   :  { %v1408_v37 = vsub.f32 %v1400_v28, %v1406_v36 }
 0xa21   :  { %v1411_v38 = vmul.f32 1.442695, %v1408_v37 }
 0xa22   :  { %v1476_v39 = vpop.permute.xlu1 %1475 }
 0xa23   :  { %2368 = vpow2.f32 %v1411_v38  ;;  %v1481_v40 = vsel %vm507_vm5, %v1476_v39, 0 }
 0xa24   :  { %2228 = vmatpush3.bf16.msra.mxu0 %v1481_v40  ;;  %2370 = vrcp.f32 %v1415_v43 }
 0xa25   :  { %2233 = vmatprep.subr.mxu0 %v368_v53 }
 0xa2d   :  { %v2369_v41 = vpop.eup %2368 }
 0xa2e   :  { %v1416_v42 = vsel %vm380_vm2, %v2369_v41, 0.0  ;;  %v2371_v44 = vpop.eup %2370 }
 0xa2f   :  { %1417 = vadd.xlane.f32.xlu0 %v1416_v42  ;;  %v1421_v45 = vmul.f32 %v2371_v44, %v2367_v23 }
 0xa31   :  { %v1423_v47 = vsel %vm363_vm3, 0.0, %v1421_v45 }
 0xa32   :  { %v1425_v49 = vpack.c.bf16 %v1423_v47, %v1423_v47 }
 0xa45   :  { %1427 = vrot.lane.b32.xlu0 %v2902_v26, %s2641_s5 }
 0xabc   :  { %v1418_v46 = vpop.xlane.xlu0 %1417 }
 0xabd   :  { %2372 = vrcp.f32 %v1418_v46 }
 0xac0   :  { %v1428_v25 = vpop.permute.xlu0 %1427 }
 0xac1   :  { %v1433_v48 = vsel %vm507_vm5, %v1428_v25, 0 }
 0xac2   :  { %2222 = vmatpush3.bf16.msra.mxu1 %v1433_v48 }
 0xac3   :  { %2288 = vmatprep.subr.bf16.mxu1 %v2287_v34 }
 0xac5   :  { %2224 = vmatmul.mubr.msk.bf16.vlgmr.msra.gmra.mrb[36].mxu1 %vm380_vm2, %v1425_v49 }
 0xac6   :  { %2246 = vmatprep.mubr.msk.f32.mxu1 %vm187_vm0, %v2879_v12  ;;  %v1608_v12 = vld [vmem:[%s3149_s9 + $0x10] sm:$0xff]  ;;  %2290 = vmatpush3.bf16.msra.mxu1 %v2287_v34  ;;  %s2642_s9 = smov 32  }
 0xac7   :  { %v2373_v26 = vpop.eup %2372  ;;  %v2291_v31 = vpack.c.bf16 %v1609_v55, %v1608_v12 }
 0xac8   :  { %v1422_v50 = vmul.f32 %v2373_v26, %v2369_v41 }
 0xac9   :  { %2292 = vmatprep.subr.bf16.mxu1 %v2291_v31 }
 0xaca   :  { %v1424_v51 = vsel %vm364_vm4, 0.0, %v1422_v50  ;;  %2294 = vmatpush3.bf16.msra.mxu1 %v2291_v31 }
 0xacb   :  { %v1426_v52 = vpack.c.bf16 %v1424_v51, %v1424_v51  ;;  %2296 = vmatprep.subr.bf16.mxu1 %v2295_v58 }
 0xacd   :  { %2230 = vmatmul.mubr.msk.bf16.vlgmr.msra.gmra.mrb[28].mxu0 %vm380_vm2, %v1426_v52  ;;  %2247 = vmatmul.mubr.msk.f32.vlgmr.msra.gmra.mrb[2].mxu1 %vm187_vm0, %v2883_v15 }
 0xace   :  { %2234 = vmatpush3.msra.mxu0 %v368_v53  ;;  %2298 = vmatpush3.bf16.msra.mxu1 %v2295_v58 }
 0xacf   :  { %2300 = vmatprep.subr.bf16.mxu1 %v2299_v5  ;;  %2304 = vmatprep.subr.bf16.mxu0 %v2303_v17 }
 0xad2   :  { %2302 = vmatpush3.bf16.msra.mxu1 %v2299_v5 }
 0xb98   :  { %v1469_v59 = vpop.f32.mrb[36].mxu1 }
 0xb99   :  { %v2225_v60 = vpop.f32.mrb[37].mxu1  ;;  %2235 = vmatprep.mubr.msk.f32.mxu0 %vm380_vm2, %v1469_v59 }
 0xb9a   :  { %v1472_v61 = vpop.f32.mrb[38].mxu1 }
 0xb9b   :  { %v2226_v62 = vpop.f32.mrb[39].mxu1 }
 0xba0   :  { %v1517_v63 = vpop.f32.mrb[28].mxu0  ;;  %v2248_v6 = vpop.f32.mrb[2].mxu1 }
 0xba1   :  { %v2231_v0 = vpop.f32.mrb[29].mxu0  ;;  %2236 = vmatmul.mubr.msk.f32.vlgmr.msra.gmra.mrb[2].mxu0 %vm380_vm2, %v1517_v63  ;;  %v1683_v15 = vpop.f32.mrb[3].mxu1  ;;  %v1689_v21 = vadd.f32 %v2248_v6, %v2015_v20 }
 0xba2   :  { %v1520_v1 = vpop.f32.mrb[30].mxu0  ;;  %2306 = vmatpush3.bf16.msra.mxu0 %v2303_v17  ;;  %v1684_v22 = vadd.f32 %v2015_v20, %v1683_v15 }
 0xba3   :  { %v2232_v2 = vpop.f32.mrb[31].mxu0  ;;  %2308 = vmatprep.subr.bf16.mxu0 %v2307_v19 }
 0xba6   :  { %2310 = vmatpush3.bf16.msra.mxu0 %v2307_v19 }
 0xc74   :  { %v2237_v8 = vpop.f32.mrb[2].mxu0 }
 0xc75   :  { %v1595_v9 = vpop.f32.mrb[3].mxu0  ;;  %v3096_v11 = vadd.f32 %v2237_v8, %v1990_v7 }
 0xc76   :  { %v3094_v10 = vadd.f32 %v1990_v7, %v1595_v9 }
 0xc78   :  { %1791 = vrot.lane.b32.xlu1 %v3094_v10, %s2642_s9  ;;  %2257 = vmatprep.mubr.msk.f32.mxu1 %vm187_vm0, %v3094_v10 }
 0xc79   :  { %2258 = vmatmul.mubr.msk.f32.vlgmr.msra.gmra.mrb[40].mxu1 %vm187_vm0, %v3096_v11 }
 0xc7c   :  { %1793 = vrot.lane.b32.xlu1 %v3096_v11, %s2642_s9 }
 0xcea   :  { %v1792_v38 = vpop.permute.xlu1 %1791 }
 0xcee   :  { %v1794_v40 = vpop.permute.xlu1 %1793 }
 0xd4c   :  { %v2259_v23 = vpop.f32.mrb[40].mxu1 }
 0xd4d   :  { %v1778_v24 = vadd.f32 %v2259_v23, %v1689_v21  ;;  %v1768_v27 = vpop.f32.mrb[41].mxu1 }
 0xd4e   :  { %v1777_v28 = vadd.f32 %v1768_v27, %v1684_v22 }
 0xd4f   :  { %v2021_v29 = vmul.f32 -1.442695, %v1778_v24 }
 0xd50   :  { %v2020_v30 = vmul.f32 -1.442695, %v1777_v28 }
 0xd51   :  { %2374 = vpow2.f32 %v2021_v29 }
 0xd52   :  { %2376 = vpow2.f32 %v2020_v30 }
 0xd5b   :  { %v2375_v35 = vpop.eup %2374 }
 0xd5c   :  { %v2377_v16 = vpop.eup %2376  ;;  %v1786_v36 = vadd.f32 1.0, %v2375_v35 }
 0xd5d   :  { %v1785_v37 = vadd.f32 1.0, %v2377_v16 }
 0xd5e   :  { %2378 = vrcp.f32 %v1786_v36 }
 0xd5f   :  { %2380 = vrcp.f32 %v1785_v37 }
 0xd68   :  { %v2379_v39 = vpop.eup %2378 }
 0xd69   :  { %v2381_v41 = vpop.eup %2380  ;;  %v1798_v42 = vmul.f32 %v2379_v39, %v1794_v40  ;;  %v1901_v52 = vsub.f32 1.0, %v2379_v39 }
 0xd6a   :  { %v1797_v43 = vmul.f32 %v2381_v41, %v1792_v38  ;;  %v1900_v53 = vsub.f32 1.0, %v2381_v41 }
 0xd6b   :  { %1807 = vrot.lane.b32.xlu1 %v1798_v42, %s2635_s4  ;;  %v1903_v34 = vmul.f32 %v3096_v11, %v1901_v52 }
 0xd6c   :  { %1805 = vrot.lane.b32.xlu0 %v1797_v43, %s2635_s4  ;;  %v1902_v31 = vmul.f32 %v3094_v10, %v1900_v53 }
 0xddd   :  { %v1808_v45 = vpop.permute.xlu1 %1807 }
 0xdde   :  { %v1806_v44 = vpop.permute.xlu0 %1805 }
 0xddf   :  { %2268 = vmatprep.mubr.msk.f32.mxu0 %vm187_vm0, %v1806_v44 }
 0xde0   :  { %2269 = vmatmul.mubr.msk.f32.vlgmr.msra.gmra.mrb[32].mxu0 %vm187_vm0, %v1808_v45 }
 0xeb3   :  { %v2270_v46 = vpop.f32.mrb[32].mxu0 }
 0xeb4   :  { %1892 = vrot.lane.b32.xlu1 %v2270_v46, %s2643_s10  ;;  %v1879_v25 = vpop.f32.mrb[33].mxu0 }
 0xeb5   :  { %1890 = vrot.lane.b32.xlu0 %v1879_v25, %s2643_s10 }
 0xf26   :  { %v1893_v47 = vpop.permute.xlu1 %1892 }
 0xf27   :  { %v1897_v48 = vadd.f32 %v1893_v47, %v1689_v21  ;;  %v1891_v49 = vpop.permute.xlu0 %1890 }
 0xf28   :  { %v1896_v26 = vadd.f32 %v1891_v49, %v1684_v22 }
 0xf29   :  { %2382 = vtanh.f32 %v1897_v48 }
 0xf2a   :  { %2384 = vtanh.f32 %v1896_v26 }
 0xf33   :  { %v2383_v50 = vpop.eup %2382 }
 0xf34   :  { %v2385_v51 = vpop.eup %2384  ;;  %1908 = vrot.lane.b32.xlu1 %v2383_v50, %s2643_s10 }
 0xf35   :  { %1906 = vrot.lane.b32.xlu0 %v2385_v51, %s2643_s10 }
 0xfa6   :  { %v1909_v33 = vpop.permute.xlu1 %1908 }
 0xfa7   :  { %v1913_v54 = vmul.f32 %v2379_v39, %v1909_v33  ;;  %v1907_v12 = vpop.permute.xlu0 %1906 }
 0xfa8   :  { %v1912_v55 = vmul.f32 %v2381_v41, %v1907_v12 }
 0xfa9   :  { %v1915_v56 = vadd.f32 %v1913_v54, %v1903_v34 }
 0xfaa   :  { %v1914_v57 = vadd.f32 %v1912_v55, %v1902_v31 }
 0xfab   :  { %v1919_v58 = vsel %vm187_vm0, %v1915_v56, 0.0 }
 0xfac   :  { %1920 = vadd.xlane.f32.xlu1 %v1919_v58  ;;  %v1916_v59 = vsel %vm187_vm0, %v1914_v57, 0.0 }
 0xfad   :  { %1917 = vadd.xlane.f32.xlu0 %v1916_v59 }
0x1039   :  { %v1921_v60 = vpop.xlane.xlu1 %1920 }
0x103a   :  { %v1924_v61 = vmul.f32 0.03125, %v1921_v60  ;;  %v1918_v62 = vpop.xlane.xlu0 %1917 }
0x103b   :  { %v1923_v63 = vmul.f32 0.03125, %v1918_v62 }
0x103c   :  { %v1926_v0 = vsub.f32 %v1915_v56, %v1924_v61 }
0x103d   :  { %v1925_v1 = vsub.f32 %v1914_v57, %v1923_v63 }
0x103e   :  { %v1928_v4 = vmul.f32 %v1926_v0, %v1926_v0 }
0x103f   :  { %v1927_v2 = vmul.f32 %v1925_v1, %v1925_v1 }
0x1040   :  { %v1932_v5 = vsel %vm187_vm0, %v1928_v4, 0.0 }
0x1041   :  { %v1929_v3 = vsel %vm187_vm0, %v1927_v2, 0.0 }
0x1042   :  { %1930 = vadd.xlane.f32.xlu0 %v1929_v3 }
0x1046   :  { %1933 = vadd.xlane.f32.xlu0 %v1932_v5 }
0x10cf   :  { %v1931_v6 = vpop.xlane.xlu0 %1930 }
0x10d0   :  { %v1935_v15 = vmul.f32 0.03125, %v1931_v6 }
0x10d2   :  { %v1937_v7 = vadd.f32 1e-05, %v1935_v15 }
0x10d3   :  { %v1934_v8 = vpop.xlane.xlu0 %1933 }
0x10d4   :  { %2386 = vrsqrt.f32 %v1937_v7  ;;  %v1936_v9 = vmul.f32 0.03125, %v1934_v8 }
0x10d6   :  { %v1938_v10 = vadd.f32 1e-05, %v1936_v9 }
0x10d8   :  { %2388 = vrsqrt.f32 %v1938_v10 }
0x10de   :  { %v2387_v11 = vpop.eup %2386 }
0x10df   :  { %v1941_v13 = vmul.f32 %v2387_v11, %v1925_v1 }
0x10e1   :  { %v1950_v17 = vmul.f32 %v2024_v32, %v1941_v13 }
0x10e2   :  { %v2389_v18 = vpop.eup %2388 }
0x10e3   :  { %v1942_v19 = vmul.f32 %v2389_v18, %v1926_v0  ;;  %v1959_v20 = vadd.f32 %v2025_v14, %v1950_v17 }
0x10e5   :  { %v1951_v21 = vmul.f32 %v2024_v32, %v1942_v19  ;;  %1961 = vst.msk [vmem:[#allocation17] sm:$0xff] %vm187_vm0, %v1959_v20 }
0x10e7   :  { %v1960_v22 = vadd.f32 %v2025_v14, %v1951_v21 }
0x10e9   :  { %1962 = vst.msk [vmem:[#allocation17 + $0x8] sm:$0xff] %vm187_vm0, %v1960_v22 }
0x10ea   :  { %2599 = shalt.err (!%p2596_p6)
}
0x10eb   :  { %s2600_s4 = scalar_lea.hbm %s3155_s15, 256 }
0x10ec   :  { %p2601_p7 = scmp.ne.s32.totalorder %s3155_s15, %s2600_s4  ;;  %p2604_p8 = scmp.lt.u32.totalorder %s2600_s4, %s3155_s15 }
0x10ee   :  { %p2606_p9 = pnand %p2604_p8, %p2601_p7 }
0x10f0   :  { %2609 = shalt.err (!%p2606_p9)
}
0x10f1   :  { %1974 = dma.vmem_to_hbm [thread:$0]  %s1969_s0, 256, %s3155_s15, [#allocation4], %s2624_s30, %s2624_s30, %s2625_s16  }
0x10f2   :  { %2620 = dma.done.wait [#allocation4], 256  }
0x10f3   :  { %2621 = vsyncadd [#allocation4], 4294967040 }
0x10f4   :  { %1978 = vsyncpa [#allocation3], 1 }
0x10f5   :  { %1979 = vsyncpa [#allocation6], 1 }
0x10f6   :  { %1980 = vsyncpa [#allocation9], 1 }
0x10f7   :  { %1981 = vsyncpa [#allocation12], 1 }
0x10f8   :  { %1982 = vsyncpa [#allocation15], 1 }
0x10f9   :  { %1983 = vsyncpa [#allocation4], 1 }

</bundles_post_ra>
